<compile_context>
chip_gen: v7x
topology: tpu7x:2x2x1
jax: 0.10.0
libtpu: 0.0.40
codegen_flags: <defaults>
</compile_context>

<pallas_src>
import functools

import jax
import jax.numpy as jnp
from jax.experimental import pallas as pl
from jax.experimental.pallas import tpu as pltpu

EPS = 1e-5
NEG_SLOPE = 0.2


def _round_up(a, b):
    return (a + b - 1) // b * b


@functools.lru_cache(maxsize=None)
def _vmem_usable_bytes():
    # Generation-aware VMEM budget: ~75% of physical capacity
    # (64 MiB -> 48 MiB on v7x, 128 MiB -> 96 MiB on v5e/v6e).
    try:
        cap = int(getattr(pltpu.get_tpu_info(), "vmem_capacity_bytes", 0)) or (64 << 20)
    except Exception:
        cap = 64 << 20
    return max(int(cap * 3 // 4), 32 << 20)


def _vmem_limit(estimate):
    return int(min(max(2 * estimate + (8 << 20), 32 << 20), _vmem_usable_bytes()))


# ----------------------------------------------------------------------------
# Pass 1: K-tiled MXU matmul (bf16 in, f32 accumulate) + per-M-tile channel
# sum / sum-of-squares.  Stats are per-tile (no cross-tile accumulator), so the
# M axis is "parallel" and v7x's two TensorCores can split it.
# ----------------------------------------------------------------------------
def _matmul_stats_kernel(p_ref, w_ref, y_ref, stats_ref, acc_ref):
    k = pl.program_id(1)

    @pl.when(k == 0)
    def _():
        acc_ref[...] = jnp.zeros_like(acc_ref)

    acc_ref[...] += jnp.dot(p_ref[...], w_ref[...],
                            preferred_element_type=jnp.float32)

    @pl.when(k == pl.num_programs(1) - 1)
    def _():
        acc = acc_ref[...]
        y_ref[...] = acc.astype(y_ref.dtype)          # bf16 to HBM (half traffic)
        # Two sliced stores; rows 2..7 of the stats block are layout padding
        # and are never read downstream.
        stats_ref[0:1, :] = jnp.sum(acc, axis=0, keepdims=True)
        stats_ref[1:2, :] = jnp.sum(acc * acc, axis=0, keepdims=True)


def _conv_stats(patches, w, cout, cpad, tm, m_pad):
    """Conv-as-matmul.  patches: (M, K) any float dtype, w: (K, cout).
    Returns (y_bf16 (m_pad, cpad), stats (n_m*8, cpad) f32)."""
    M, K = patches.shape
    n_m = m_pad // tm
    usable = _vmem_usable_bytes()

    # K (reduction) tiling only when the full-K double-buffered working set
    # would not fit the VMEM budget (large Cin layers, esp. on v7x).
    fixed = tm * cpad * 4 + 2 * (tm * cpad * 2 + 8 * cpad * 4)

    def k_bytes(tk):
        return 2 * (tm * tk * 2 + tk * cpad * 2)

    tk = K
    if fixed + k_bytes(K) + (8 << 20) > usable:
        tk = 2048
        while tk > 128 and fixed + k_bytes(tk) + (8 << 20) > usable:
            tk //= 2
    k_pad = _round_up(K, tk)
    n_k = k_pad // tk

    p = patches.astype(jnp.bfloat16)
    if m_pad != M or k_pad != K:
        p = jnp.pad(p, ((0, m_pad - M), (0, k_pad - K)))
    wp = jnp.pad(w.astype(jnp.bfloat16), ((0, k_pad - K), (0, cpad - cout)))

    y, stats = pl.pallas_call(
        _matmul_stats_kernel,
        out_shape=(jax.ShapeDtypeStruct((m_pad, cpad), jnp.bfloat16),
                   jax.ShapeDtypeStruct((n_m * 8, cpad), jnp.float32)),
        grid=(n_m, n_k),
        in_specs=[pl.BlockSpec((tm, tk), lambda i, k: (i, k)),
                  pl.BlockSpec((tk, cpad), lambda i, k: (k, 0))],
        out_specs=(pl.BlockSpec((tm, cpad), lambda i, k: (i, 0)),
                   pl.BlockSpec((8, cpad), lambda i, k: (i, 0))),
        scratch_shapes=[pltpu.VMEM((tm, cpad), jnp.float32)],
        compiler_params=pltpu.CompilerParams(
            dimension_semantics=("parallel", "arbitrary"),
            vmem_limit_bytes=_vmem_limit(fixed + k_bytes(tk))),
    )(p, wp)
    return y, stats


# ----------------------------------------------------------------------------
# BN fold: tiny per-channel math on (1, Cpad) arrays (XLA glue inside the jit).
# ----------------------------------------------------------------------------
def _fold_bn(stats, gamma, beta, m, cout, cpad):
    st = stats.reshape(-1, 8, cpad)
    ssum = jnp.sum(st[:, 0, :], axis=0)
    ssq = jnp.sum(st[:, 1, :], axis=0)
    mean = ssum / m
    var = jnp.maximum(ssq / m - mean * mean, 0.0)
    inv = jax.lax.rsqrt(var + EPS)
    g = jnp.pad(gamma.astype(jnp.float32), (0, cpad - cout))
    b = jnp.pad(beta.astype(jnp.float32), (0, cpad - cout))
    scale = g * inv               # padded channels: gamma == 0 -> scale == 0
    shift = b - mean * scale
    return scale.reshape(1, cpad), shift.reshape(1, cpad)


# ----------------------------------------------------------------------------
# Pass 2: y*scale+shift  [+ r*rscale+rshift]  [LeakyReLU].  Pure mem-bound FMA
# epilogue on bf16 streams; residual BN (downsample branch) is folded in here.
# ----------------------------------------------------------------------------
def _bn_res_act_kernel(*refs, act, has_res):
    if has_res:
        y_ref, sc_ref, sh_ref, r_ref, rsc_ref, rsh_ref, o_ref = refs
    else:
        y_ref, sc_ref, sh_ref, o_ref = refs
    y = y_ref[...].astype(jnp.float32) * sc_ref[...] + sh_ref[...]
    if has_res:
        y = y + (r_ref[...].astype(jnp.float32) * rsc_ref[...] + rsh_ref[...])
    if act:
        y = jnp.where(y >= 0, y, NEG_SLOPE * y)       # LeakyReLU(0.2)
    o_ref[...] = y.astype(o_ref.dtype)


def _bn_act(y, scale, shift, *, tm, cpad, act, residual=None,
            out_dtype=jnp.bfloat16):
    m_pad = y.shape[0]
    n1 = m_pad // tm
    usable = _vmem_usable_bytes()
    out_b = jnp.dtype(out_dtype).itemsize
    in_streams = 2 if residual is not None else 1

    # Mem-bound phase: grow the row tile (multiple of tm dividing m_pad) as
    # large as the double-buffered streams allow, to amortize per-step overhead.
    tm2 = tm
    for d in range(1, n1 + 1):
        if n1 % d:
            continue
        cand = tm * d
        need = 2 * cand * cpad * (in_streams * 2 + out_b) + (4 << 20)
        if cand <= 8192 and need <= usable:
            tm2 = cand
    n2 = m_pad // tm2

    inputs = [y, scale, shift]
    in_specs = [pl.BlockSpec((tm2, cpad), lambda i: (i, 0)),
                pl.BlockSpec((1, cpad), lambda i: (0, 0)),
                pl.BlockSpec((1, cpad), lambda i: (0, 0))]
    if residual is not None:
        r, rsc, rsh = residual
        inputs += [r, rsc, rsh]
        in_specs += [pl.BlockSpec((tm2, cpad), lambda i: (i, 0)),
                     pl.BlockSpec((1, cpad), lambda i: (0, 0)),
                     pl.BlockSpec((1, cpad), lambda i: (0, 0))]

    kernel = functools.partial(_bn_res_act_kernel, act=act,
                               has_res=residual is not None)
    est = 2 * tm2 * cpad * (in_streams * 2 + out_b) + 6 * cpad * 4
    return pl.pallas_call(
        kernel,
        out_shape=jax.ShapeDtypeStruct((m_pad, cpad), out_dtype),
        grid=(n2,),
        in_specs=in_specs,
        out_specs=pl.BlockSpec((tm2, cpad), lambda i: (i, 0)),
        compiler_params=pltpu.CompilerParams(
            dimension_semantics=("parallel",),
            vmem_limit_bytes=_vmem_limit(est)),
    )(*inputs)


# ----------------------------------------------------------------------------
# Plain-JAX glue (inside the same jit): im2col patch extraction, no math.
# ----------------------------------------------------------------------------
def _im2col_3x3(x_nhwc, stride):
    N, H, W, C = x_nhwc.shape
    pad = 1
    xp = jnp.pad(x_nhwc, ((0, 0), (pad, pad), (pad, pad), (0, 0)))
    Ho = (H + 2 * pad - 3) // stride + 1
    Wo = (W + 2 * pad - 3) // stride + 1
    cols = []
    for di in range(3):
        for dj in range(3):
            cols.append(xp[:, di:di + stride * Ho:stride,
                           dj:dj + stride * Wo:stride, :])
    p = jnp.concatenate(cols, axis=-1)              # (N, Ho, Wo, 9*C)
    return p.reshape(N * Ho * Wo, 9 * C), Ho, Wo


# ----------------------------------------------------------------------------
# ResidualBlock forward (NCHW in / NCHW out, like the PyTorch module).
# ----------------------------------------------------------------------------
def residual_block_forward(x_nchw, params, stride):
    N, Cin, H, W = x_nchw.shape
    Cout = params["w1"].shape[1]
    x = jnp.transpose(x_nchw, (0, 2, 3, 1)).astype(jnp.bfloat16)   # NHWC bf16

    p1, Ho, Wo = _im2col_3x3(x, stride)
    M = N * Ho * Wo
    cpad = _round_up(Cout, 128)                  # lane-dense output slab
    tm = min(512, _round_up(M, 16))              # bf16-friendly row tile
    m_pad = _round_up(M, tm)

    # conv1 -> bn1 -> LeakyReLU    (stays bf16 + padded for the next im2col)
    y1, st1 = _conv_stats(p1, params["w1"], Cout, cpad, tm, m_pad)
    sc1, sh1 = _fold_bn(st1, params["g1"], params["beta1"], M, Cout, cpad)
    h1 = _bn_act(y1, sc1, sh1, tm=tm, cpad=cpad, act=True)

    # identity branch: 1x1-conv downsample + BN, folded into conv2's pass 2.
    if "wd" in params:
        xs = x[:, ::stride, ::stride, :].reshape(M, Cin)
        yd, std_ = _conv_stats(xs, params["wd"], Cout, cpad, tm, m_pad)
        scd, shd = _fold_bn(std_, params["gd"], params["betad"], M, Cout, cpad)
        residual = (yd, scd, shd)
    else:
        # module guarantees stride == 1 and Cin == Cout in this branch
        r = jnp.pad(x.reshape(M, Cin), ((0, m_pad - M), (0, cpad - Cin)))
        residual = (r, jnp.ones((1, cpad), jnp.float32),
                    jnp.zeros((1, cpad), jnp.float32))

    # conv2 -> bn2 -> (+identity) -> LeakyReLU
    h1c = h1[:M, :Cout].reshape(N, Ho, Wo, Cout)
    p2, _, _ = _im2col_3x3(h1c, 1)
    y2, st2 = _conv_stats(p2, params["w2"], Cout, cpad, tm, m_pad)
    sc2, sh2 = _fold_bn(st2, params["g2"], params["beta2"], M, Cout, cpad)
    out = _bn_act(y2, sc2, sh2, tm=tm, cpad=cpad, act=True,
                  residual=residual, out_dtype=jnp.float32)

    out = out[:M, :Cout].reshape(N, Ho, Wo, Cout)
    return jnp.transpose(out, (0, 3, 1, 2))


# ----------------------------------------------------------------------------
# Pure-JAX reference (lax conv in bf16, f32 everywhere else).  The Pallas path
# additionally keeps inter-stage activations in bf16, so tolerances below are
# set for that precision policy.
# ----------------------------------------------------------------------------
def _ref_forward(x_nchw, params, stride):
    x = jnp.transpose(x_nchw, (0, 2, 3, 1))
    Cout = params["w1"].shape[1]

    def conv(inp, w_mat, b, k, s, pad):
        w_hwio = w_mat.reshape(k, k, inp.shape[-1], Cout).astype(jnp.bfloat16)
        y = jax.lax.conv_general_dilated(
            inp.astype(jnp.bfloat16), w_hwio, (s, s), [(pad, pad), (pad, pad)],
            dimension_numbers=("NHWC", "HWIO", "NHWC"),
            preferred_element_type=jnp.float32)
        return y + b

    def bn(y, g, bta):
        m = jnp.mean(y, axis=(0, 1, 2), keepdims=True)
        v = jnp.mean((y - m) ** 2, axis=(0, 1, 2), keepdims=True)
        return g * (y - m) * jax.lax.rsqrt(v + EPS) + bta

    def lrelu(y):
        return jnp.where(y >= 0, y, NEG_SLOPE * y)

    if "wd" in params:
        identity = bn(conv(x, params["wd"], params["bd"], 1, stride, 0),
                      params["gd"], params["betad"])
    else:
        identity = x
    out = lrelu(bn(conv(x, params["w1"], params["b1"], 3, stride, 1),
                   params["g1"], params["beta1"]))
    out = bn(conv(out, params["w2"], params["b2"], 3, 1, 1),
             params["g2"], params["beta2"])
    out = lrelu(out + identity)
    return jnp.transpose(out, (0, 3, 1, 2))


# ----------------------------------------------------------------------------
if __name__ == "__main__":
    # ResidualBlock(in_channels=4, out_channels=8, stride=2)
    N, Cin, H, W = 2, 4, 16, 16
    Cout, stride = 8, 2

    key = jax.random.PRNGKey(0)
    ks = jax.random.split(key, 12)

    def nrm(k, shape, scale=0.1):
        return (scale * jax.random.normal(k, shape)).astype(jnp.float32)

    params = {
        # conv1: 3x3, Cin->Cout.  Matrix layout (kh*kw*Cin, Cout), rows (kh,kw,ci).
        "w1": nrm(ks[0], (9 * Cin, Cout)), "b1": nrm(ks[1], (Cout,)),
        "g1": 1.0 + nrm(ks[2], (Cout,)),  "beta1": nrm(ks[3], (Cout,)),
        # conv2: 3x3, Cout->Cout.
        "w2": nrm(ks[4], (9 * Cout, Cout)), "b2": nrm(ks[5], (Cout,)),
        "g2": 1.0 + nrm(ks[6], (Cout,)),   "beta2": nrm(ks[7], (Cout,)),
        # downsample: 1x1 conv Cin->Cout, stride 2, + BN.
        "wd": nrm(ks[8], (Cin, Cout)),  "bd": nrm(ks[9], (Cout,)),
        "gd": 1.0 + nrm(ks[10], (Cout,)), "betad": nrm(ks[11], (Cout,)),
    }

    x = jax.random.normal(jax.random.PRNGKey(42), (N, Cin, H, W),
                          dtype=jnp.float32)

    fwd = jax.jit(residual_block_forward, static_argnums=(2,))
    out = jax.block_until_ready(fwd(x, params, stride))
    ref = jax.block_until_ready(_ref_forward(x, params, stride))

    assert out.shape == (N, Cout, H // stride, W // stride), out.shape
    # Tolerance covers the bf16 inter-stage precision policy (f32 reference).
    max_err = float(jnp.max(jnp.abs(out - ref)))
    assert jnp.allclose(out, ref, atol=3e-2, rtol=3e-2), max_err
    print("KERNEL_OK")
</pallas_src>

<mosaic_0001>
module attributes {stable_mosaic.version = 11 : i64} {
  func.func @_bn_res_act_kernel(%arg0: i32, %arg1: memref<128x128xbf16, #tpu.memory_space<vmem>>, %arg2: memref<1x128xf32, #tpu.memory_space<vmem>>, %arg3: memref<1x128xf32, #tpu.memory_space<vmem>>, %arg4: memref<128x128xbf16, #tpu.memory_space<vmem>>) attributes {dimension_semantics = [#tpu.dimension_semantics<parallel>], iteration_bounds = array<i64: 1>, scalar_prefetch = 0 : i64, scratch_operands = 0 : i64, tpu.core_type = #tpu.core_type<tc>, window_params = [{transform_indices = @transform_0, window_bounds = array<i64: 128, 128>}, {pipeline_mode = #tpu.pipeline_mode<synchronous>, transform_indices = @transform_1, window_bounds = array<i64: 1, 128>}, {pipeline_mode = #tpu.pipeline_mode<synchronous>, transform_indices = @transform_2, window_bounds = array<i64: 1, 128>}, {transform_indices = @transform_3, window_bounds = array<i64: 128, 128>}]} {
    %c0 = arith.constant 0 : index
    %c0_0 = arith.constant 0 : index
    %0 = vector.load %arg1[%c0, %c0_0] : memref<128x128xbf16, #tpu.memory_space<vmem>>, vector<128x128xbf16>
    %1 = arith.extf %0 : vector<128x128xbf16> to vector<128x128xf32>
    %c0_1 = arith.constant 0 : index
    %c0_2 = arith.constant 0 : index
    %2 = vector.load %arg2[%c0_1, %c0_2] : memref<1x128xf32, #tpu.memory_space<vmem>>, vector<1x128xf32>
    %3 = vector.broadcast %2 : vector<1x128xf32> to vector<128x128xf32>
    %4 = arith.mulf %1, %3 : vector<128x128xf32>
    %c0_3 = arith.constant 0 : index
    %c0_4 = arith.constant 0 : index
    %5 = vector.load %arg3[%c0_3, %c0_4] : memref<1x128xf32, #tpu.memory_space<vmem>>, vector<1x128xf32>
    %6 = vector.broadcast %5 : vector<1x128xf32> to vector<128x128xf32>
    %7 = arith.addf %4, %6 : vector<128x128xf32>
    %cst = arith.constant 0.000000e+00 : f32
    %8 = vector.broadcast %cst : f32 to vector<128x128xf32>
    %9 = arith.cmpf oge, %7, %8 : vector<128x128xf32>
    %cst_5 = arith.constant 2.000000e-01 : f32
    %10 = vector.broadcast %cst_5 : f32 to vector<128x128xf32>
    %11 = arith.mulf %10, %7 : vector<128x128xf32>
    %12 = arith.select %9, %7, %11 : vector<128x128xi1>, vector<128x128xf32>
    %13 = arith.truncf %12 : vector<128x128xf32> to vector<128x128xbf16>
    %c0_6 = arith.constant 0 : index
    %c0_7 = arith.constant 0 : index
    %14 = vector.load %arg4[%c0_6, %c0_7] : memref<128x128xbf16, #tpu.memory_space<vmem>>, vector<128x128xbf16>
    tpu.vector_store %arg4[%c0_6, %c0_7], %13 {strides = array<i32>} : memref<128x128xbf16, #tpu.memory_space<vmem>>, vector<128x128xbf16>,
    return
  }
  func.func @transform_0(%arg0: i32) -> (i32, i32) {
    %c0_i32 = arith.constant 0 : i32
    %c0_i32_0 = arith.constant 0 : i32
    return %arg0, %c0_i32 : i32, i32
  }
  func.func @transform_1(%arg0: i32) -> (i32, i32) {
    %c0_i32 = arith.constant 0 : i32
    %c0_i32_0 = arith.constant 0 : i32
    %c0_i32_1 = arith.constant 0 : i32
    return %c0_i32, %c0_i32_0 : i32, i32
  }
  func.func @transform_2(%arg0: i32) -> (i32, i32) {
    %c0_i32 = arith.constant 0 : i32
    %c0_i32_0 = arith.constant 0 : i32
    %c0_i32_1 = arith.constant 0 : i32
    return %c0_i32, %c0_i32_0 : i32, i32
  }
  func.func @transform_3(%arg0: i32) -> (i32, i32) {
    %c0_i32 = arith.constant 0 : i32
    %c0_i32_0 = arith.constant 0 : i32
    return %arg0, %c0_i32 : i32, i32
  }
}

module attributes {stable_mosaic.version = 11 : i64} {
  func.func @_matmul_stats_kernel(%arg0: i32, %arg1: i32, %arg2: memref<128x36xbf16, #tpu.memory_space<vmem>>, %arg3: memref<36x128xbf16, #tpu.memory_space<vmem>>, %arg4: memref<128x128xbf16, #tpu.memory_space<vmem>>, %arg5: memref<8x128xf32, #tpu.memory_space<vmem>>, %arg6: memref<128x128xf32, #tpu.memory_space<vmem>>) attributes {dimension_semantics = [#tpu.dimension_semantics<parallel>, #tpu.dimension_semantics<arbitrary>], iteration_bounds = array<i64: 1, 1>, scalar_prefetch = 0 : i64, scratch_operands = 1 : i64, tpu.core_type = #tpu.core_type<tc>, window_params = [{transform_indices = @transform_0, window_bounds = array<i64: 128, 36>}, {transform_indices = @transform_1, window_bounds = array<i64: 36, 128>}, {transform_indices = @transform_2, window_bounds = array<i64: 128, 128>}, {transform_indices = @transform_3, window_bounds = array<i64: 8, 128>}]} {
    %c0_i32 = arith.constant 0 : i32
    %0 = arith.cmpi eq, %arg1, %c0_i32 : i32
    %1 = arith.extui %0 : i1 to i32
    %c0_i32_0 = arith.constant 0 : i32
    %2 = arith.cmpi ne, %1, %c0_i32_0 : i32
    scf.if %2 {
      %cst_10 = arith.constant 0.000000e+00 : f32
      %12 = vector.broadcast %cst_10 : f32 to vector<128x128xf32>
      %c0_11 = arith.constant 0 : index
      %c0_12 = arith.constant 0 : index
      %13 = vector.load %arg6[%c0_11, %c0_12] : memref<128x128xf32, #tpu.memory_space<vmem>>, vector<128x128xf32>
      tpu.vector_store %arg6[%c0_11, %c0_12], %12 {strides = array<i32>} : memref<128x128xf32, #tpu.memory_space<vmem>>, vector<128x128xf32>,
    } else {
    }
    %c0 = arith.constant 0 : index
    %c0_1 = arith.constant 0 : index
    %3 = vector.load %arg6[%c0, %c0_1] : memref<128x128xf32, #tpu.memory_space<vmem>>, vector<128x128xf32>
    %c0_2 = arith.constant 0 : index
    %c0_3 = arith.constant 0 : index
    %4 = vector.load %arg2[%c0_2, %c0_3] : memref<128x36xbf16, #tpu.memory_space<vmem>>, vector<128x36xbf16>
    %c0_4 = arith.constant 0 : index
    %c0_5 = arith.constant 0 : index
    %5 = vector.load %arg3[%c0_4, %c0_5] : memref<36x128xbf16, #tpu.memory_space<vmem>>, vector<36x128xbf16>
    %cst = arith.constant dense<0.000000e+00> : vector<128x128xf32>
    %6 = tpu.matmul %4, %5, %cst {dimension_numbers = #tpu.dot_dimension_numbers<[1], [0], [0], [1], [0, 0, 1, 1], [], []>} : vector<128x36xbf16>, vector<36x128xbf16>, vector<128x128xf32> -> vector<128x128xf32>
    %7 = arith.addf %3, %6 : vector<128x128xf32>
    %c0_6 = arith.constant 0 : index
    %c0_7 = arith.constant 0 : index
    %8 = vector.load %arg6[%c0_6, %c0_7] : memref<128x128xf32, #tpu.memory_space<vmem>>, vector<128x128xf32>
    tpu.vector_store %arg6[%c0_6, %c0_7], %7 {strides = array<i32>} : memref<128x128xf32, #tpu.memory_space<vmem>>, vector<128x128xf32>,
    %c0_i32_8 = arith.constant 0 : i32
    %9 = arith.cmpi eq, %arg1, %c0_i32_8 : i32
    %10 = arith.extui %9 : i1 to i32
    %c0_i32_9 = arith.constant 0 : i32
    %11 = arith.cmpi ne, %10, %c0_i32_9 : i32
    scf.if %11 {
      %c0_10 = arith.constant 0 : index
      %c0_11 = arith.constant 0 : index
      %12 = vector.load %arg6[%c0_10, %c0_11] : memref<128x128xf32, #tpu.memory_space<vmem>>, vector<128x128xf32>
      %13 = arith.truncf %12 : vector<128x128xf32> to vector<128x128xbf16>
      %c0_12 = arith.constant 0 : index
      %c0_13 = arith.constant 0 : index
      %14 = vector.load %arg4[%c0_12, %c0_13] : memref<128x128xbf16, #tpu.memory_space<vmem>>, vector<128x128xbf16>
      tpu.vector_store %arg4[%c0_12, %c0_13], %13 {strides = array<i32>} : memref<128x128xbf16, #tpu.memory_space<vmem>>, vector<128x128xbf16>,
      %cst_14 = arith.constant dense<0.000000e+00> : vector<128xf32>
      %15 = vector.multi_reduction <add>, %12, %cst_14 [0] : vector<128x128xf32> to vector<128xf32>
      %16 = vector.shape_cast %15 : vector<128xf32> to vector<1x128xf32>
      %c0_15 = arith.constant 0 : index
      %c0_16 = arith.constant 0 : index
      %17 = vector.load %arg5[%c0_15, %c0_16] : memref<8x128xf32, #tpu.memory_space<vmem>>, vector<1x128xf32>
      tpu.vector_store %arg5[%c0_15, %c0_16], %16 {strides = array<i32>} : memref<8x128xf32, #tpu.memory_space<vmem>>, vector<1x128xf32>,
      %18 = arith.mulf %12, %12 : vector<128x128xf32>
      %cst_17 = arith.constant dense<0.000000e+00> : vector<128xf32>
      %19 = vector.multi_reduction <add>, %18, %cst_17 [0] : vector<128x128xf32> to vector<128xf32>
      %20 = vector.shape_cast %19 : vector<128xf32> to vector<1x128xf32>
      %c1 = arith.constant 1 : index
      %c0_18 = arith.constant 0 : index
      %21 = vector.load %arg5[%c1, %c0_18] : memref<8x128xf32, #tpu.memory_space<vmem>>, vector<1x128xf32>
      tpu.vector_store %arg5[%c1, %c0_18], %20 {strides = array<i32>} : memref<8x128xf32, #tpu.memory_space<vmem>>, vector<1x128xf32>,
    } else {
    }
    return
  }
  func.func @transform_0(%arg0: i32, %arg1: i32) -> (i32, i32) {
    %c0_i32 = arith.constant 0 : i32
    return %arg0, %arg1 : i32, i32
  }
  func.func @transform_1(%arg0: i32, %arg1: i32) -> (i32, i32) {
    %c0_i32 = arith.constant 0 : i32
    %c0_i32_0 = arith.constant 0 : i32
    return %arg1, %c0_i32 : i32, i32
  }
  func.func @transform_2(%arg0: i32, %arg1: i32) -> (i32, i32) {
    %c0_i32 = arith.constant 0 : i32
    %c0_i32_0 = arith.constant 0 : i32
    return %arg0, %c0_i32 : i32, i32
  }
  func.func @transform_3(%arg0: i32, %arg1: i32) -> (i32, i32) {
    %c0_i32 = arith.constant 0 : i32
    %c0_i32_0 = arith.constant 0 : i32
    return %arg0, %c0_i32 : i32, i32
  }
}

module attributes {stable_mosaic.version = 11 : i64} {
  func.func @_matmul_stats_kernel(%arg0: i32, %arg1: i32, %arg2: memref<128x72xbf16, #tpu.memory_space<vmem>>, %arg3: memref<72x128xbf16, #tpu.memory_space<vmem>>, %arg4: memref<128x128xbf16, #tpu.memory_space<vmem>>, %arg5: memref<8x128xf32, #tpu.memory_space<vmem>>, %arg6: memref<128x128xf32, #tpu.memory_space<vmem>>) attributes {dimension_semantics = [#tpu.dimension_semantics<parallel>, #tpu.dimension_semantics<arbitrary>], iteration_bounds = array<i64: 1, 1>, scalar_prefetch = 0 : i64, scratch_operands = 1 : i64, tpu.core_type = #tpu.core_type<tc>, window_params = [{transform_indices = @transform_0, window_bounds = array<i64: 128, 72>}, {transform_indices = @transform_1, window_bounds = array<i64: 72, 128>}, {transform_indices = @transform_2, window_bounds = array<i64: 128, 128>}, {transform_indices = @transform_3, window_bounds = array<i64: 8, 128>}]} {
    %c0_i32 = arith.constant 0 : i32
    %0 = arith.cmpi eq, %arg1, %c0_i32 : i32
    %1 = arith.extui %0 : i1 to i32
    %c0_i32_0 = arith.constant 0 : i32
    %2 = arith.cmpi ne, %1, %c0_i32_0 : i32
    scf.if %2 {
      %cst_10 = arith.constant 0.000000e+00 : f32
      %12 = vector.broadcast %cst_10 : f32 to vector<128x128xf32>
      %c0_11 = arith.constant 0 : index
      %c0_12 = arith.constant 0 : index
      %13 = vector.load %arg6[%c0_11, %c0_12] : memref<128x128xf32, #tpu.memory_space<vmem>>, vector<128x128xf32>
      tpu.vector_store %arg6[%c0_11, %c0_12], %12 {strides = array<i32>} : memref<128x128xf32, #tpu.memory_space<vmem>>, vector<128x128xf32>,
    } else {
    }
    %c0 = arith.constant 0 : index
    %c0_1 = arith.constant 0 : index
    %3 = vector.load %arg6[%c0, %c0_1] : memref<128x128xf32, #tpu.memory_space<vmem>>, vector<128x128xf32>
    %c0_2 = arith.constant 0 : index
    %c0_3 = arith.constant 0 : index
    %4 = vector.load %arg2[%c0_2, %c0_3] : memref<128x72xbf16, #tpu.memory_space<vmem>>, vector<128x72xbf16>
    %c0_4 = arith.constant 0 : index
    %c0_5 = arith.constant 0 : index
    %5 = vector.load %arg3[%c0_4, %c0_5] : memref<72x128xbf16, #tpu.memory_space<vmem>>, vector<72x128xbf16>
    %cst = arith.constant dense<0.000000e+00> : vector<128x128xf32>
    %6 = tpu.matmul %4, %5, %cst {dimension_numbers = #tpu.dot_dimension_numbers<[1], [0], [0], [1], [0, 0, 1, 1], [], []>} : vector<128x72xbf16>, vector<72x128xbf16>, vector<128x128xf32> -> vector<128x128xf32>
    %7 = arith.addf %3, %6 : vector<128x128xf32>
    %c0_6 = arith.constant 0 : index
    %c0_7 = arith.constant 0 : index
    %8 = vector.load %arg6[%c0_6, %c0_7] : memref<128x128xf32, #tpu.memory_space<vmem>>, vector<128x128xf32>
    tpu.vector_store %arg6[%c0_6, %c0_7], %7 {strides = array<i32>} : memref<128x128xf32, #tpu.memory_space<vmem>>, vector<128x128xf32>,
    %c0_i32_8 = arith.constant 0 : i32
    %9 = arith.cmpi eq, %arg1, %c0_i32_8 : i32
    %10 = arith.extui %9 : i1 to i32
    %c0_i32_9 = arith.constant 0 : i32
    %11 = arith.cmpi ne, %10, %c0_i32_9 : i32
    scf.if %11 {
      %c0_10 = arith.constant 0 : index
      %c0_11 = arith.constant 0 : index
      %12 = vector.load %arg6[%c0_10, %c0_11] : memref<128x128xf32, #tpu.memory_space<vmem>>, vector<128x128xf32>
      %13 = arith.truncf %12 : vector<128x128xf32> to vector<128x128xbf16>
      %c0_12 = arith.constant 0 : index
      %c0_13 = arith.constant 0 : index
      %14 = vector.load %arg4[%c0_12, %c0_13] : memref<128x128xbf16, #tpu.memory_space<vmem>>, vector<128x128xbf16>
      tpu.vector_store %arg4[%c0_12, %c0_13], %13 {strides = array<i32>} : memref<128x128xbf16, #tpu.memory_space<vmem>>, vector<128x128xbf16>,
      %cst_14 = arith.constant dense<0.000000e+00> : vector<128xf32>
      %15 = vector.multi_reduction <add>, %12, %cst_14 [0] : vector<128x128xf32> to vector<128xf32>
      %16 = vector.shape_cast %15 : vector<128xf32> to vector<1x128xf32>
      %c0_15 = arith.constant 0 : index
      %c0_16 = arith.constant 0 : index
      %17 = vector.load %arg5[%c0_15, %c0_16] : memref<8x128xf32, #tpu.memory_space<vmem>>, vector<1x128xf32>
      tpu.vector_store %arg5[%c0_15, %c0_16], %16 {strides = array<i32>} : memref<8x128xf32, #tpu.memory_space<vmem>>, vector<1x128xf32>,
      %18 = arith.mulf %12, %12 : vector<128x128xf32>
      %cst_17 = arith.constant dense<0.000000e+00> : vector<128xf32>
      %19 = vector.multi_reduction <add>, %18, %cst_17 [0] : vector<128x128xf32> to vector<128xf32>
      %20 = vector.shape_cast %19 : vector<128xf32> to vector<1x128xf32>
      %c1 = arith.constant 1 : index
      %c0_18 = arith.constant 0 : index
      %21 = vector.load %arg5[%c1, %c0_18] : memref<8x128xf32, #tpu.memory_space<vmem>>, vector<1x128xf32>
      tpu.vector_store %arg5[%c1, %c0_18], %20 {strides = array<i32>} : memref<8x128xf32, #tpu.memory_space<vmem>>, vector<1x128xf32>,
    } else {
    }
    return
  }
  func.func @transform_0(%arg0: i32, %arg1: i32) -> (i32, i32) {
    %c0_i32 = arith.constant 0 : i32
    return %arg0, %arg1 : i32, i32
  }
  func.func @transform_1(%arg0: i32, %arg1: i32) -> (i32, i32) {
    %c0_i32 = arith.constant 0 : i32
    %c0_i32_0 = arith.constant 0 : i32
    return %arg1, %c0_i32 : i32, i32
  }
  func.func @transform_2(%arg0: i32, %arg1: i32) -> (i32, i32) {
    %c0_i32 = arith.constant 0 : i32
    %c0_i32_0 = arith.constant 0 : i32
    return %arg0, %c0_i32 : i32, i32
  }
  func.func @transform_3(%arg0: i32, %arg1: i32) -> (i32, i32) {
    %c0_i32 = arith.constant 0 : i32
    %c0_i32_0 = arith.constant 0 : i32
    return %arg0, %c0_i32 : i32, i32
  }
}

module attributes {stable_mosaic.version = 11 : i64} {
  func.func @_matmul_stats_kernel(%arg0: i32, %arg1: i32, %arg2: memref<128x4xbf16, #tpu.memory_space<vmem>>, %arg3: memref<4x128xbf16, #tpu.memory_space<vmem>>, %arg4: memref<128x128xbf16, #tpu.memory_space<vmem>>, %arg5: memref<8x128xf32, #tpu.memory_space<vmem>>, %arg6: memref<128x128xf32, #tpu.memory_space<vmem>>) attributes {dimension_semantics = [#tpu.dimension_semantics<parallel>, #tpu.dimension_semantics<arbitrary>], iteration_bounds = array<i64: 1, 1>, scalar_prefetch = 0 : i64, scratch_operands = 1 : i64, tpu.core_type = #tpu.core_type<tc>, window_params = [{transform_indices = @transform_0, window_bounds = array<i64: 128, 4>}, {transform_indices = @transform_1, window_bounds = array<i64: 4, 128>}, {transform_indices = @transform_2, window_bounds = array<i64: 128, 128>}, {transform_indices = @transform_3, window_bounds = array<i64: 8, 128>}]} {
    %c0_i32 = arith.constant 0 : i32
    %0 = arith.cmpi eq, %arg1, %c0_i32 : i32
    %1 = arith.extui %0 : i1 to i32
    %c0_i32_0 = arith.constant 0 : i32
    %2 = arith.cmpi ne, %1, %c0_i32_0 : i32
    scf.if %2 {
      %cst_10 = arith.constant 0.000000e+00 : f32
      %12 = vector.broadcast %cst_10 : f32 to vector<128x128xf32>
      %c0_11 = arith.constant 0 : index
      %c0_12 = arith.constant 0 : index
      %13 = vector.load %arg6[%c0_11, %c0_12] : memref<128x128xf32, #tpu.memory_space<vmem>>, vector<128x128xf32>
      tpu.vector_store %arg6[%c0_11, %c0_12], %12 {strides = array<i32>} : memref<128x128xf32, #tpu.memory_space<vmem>>, vector<128x128xf32>,
    } else {
    }
    %c0 = arith.constant 0 : index
    %c0_1 = arith.constant 0 : index
    %3 = vector.load %arg6[%c0, %c0_1] : memref<128x128xf32, #tpu.memory_space<vmem>>, vector<128x128xf32>
    %c0_2 = arith.constant 0 : index
    %c0_3 = arith.constant 0 : index
    %4 = vector.load %arg2[%c0_2, %c0_3] : memref<128x4xbf16, #tpu.memory_space<vmem>>, vector<128x4xbf16>
    %c0_4 = arith.constant 0 : index
    %c0_5 = arith.constant 0 : index
    %5 = vector.load %arg3[%c0_4, %c0_5] : memref<4x128xbf16, #tpu.memory_space<vmem>>, vector<4x128xbf16>
    %cst = arith.constant dense<0.000000e+00> : vector<128x128xf32>
    %6 = tpu.matmul %4, %5, %cst {dimension_numbers = #tpu.dot_dimension_numbers<[1], [0], [0], [1], [0, 0, 1, 1], [], []>} : vector<128x4xbf16>, vector<4x128xbf16>, vector<128x128xf32> -> vector<128x128xf32>
    %7 = arith.addf %3, %6 : vector<128x128xf32>
    %c0_6 = arith.constant 0 : index
    %c0_7 = arith.constant 0 : index
    %8 = vector.load %arg6[%c0_6, %c0_7] : memref<128x128xf32, #tpu.memory_space<vmem>>, vector<128x128xf32>
    tpu.vector_store %arg6[%c0_6, %c0_7], %7 {strides = array<i32>} : memref<128x128xf32, #tpu.memory_space<vmem>>, vector<128x128xf32>,
    %c0_i32_8 = arith.constant 0 : i32
    %9 = arith.cmpi eq, %arg1, %c0_i32_8 : i32
    %10 = arith.extui %9 : i1 to i32
    %c0_i32_9 = arith.constant 0 : i32
    %11 = arith.cmpi ne, %10, %c0_i32_9 : i32
    scf.if %11 {
      %c0_10 = arith.constant 0 : index
      %c0_11 = arith.constant 0 : index
      %12 = vector.load %arg6[%c0_10, %c0_11] : memref<128x128xf32, #tpu.memory_space<vmem>>, vector<128x128xf32>
      %13 = arith.truncf %12 : vector<128x128xf32> to vector<128x128xbf16>
      %c0_12 = arith.constant 0 : index
      %c0_13 = arith.constant 0 : index
      %14 = vector.load %arg4[%c0_12, %c0_13] : memref<128x128xbf16, #tpu.memory_space<vmem>>, vector<128x128xbf16>
      tpu.vector_store %arg4[%c0_12, %c0_13], %13 {strides = array<i32>} : memref<128x128xbf16, #tpu.memory_space<vmem>>, vector<128x128xbf16>,
      %cst_14 = arith.constant dense<0.000000e+00> : vector<128xf32>
      %15 = vector.multi_reduction <add>, %12, %cst_14 [0] : vector<128x128xf32> to vector<128xf32>
      %16 = vector.shape_cast %15 : vector<128xf32> to vector<1x128xf32>
      %c0_15 = arith.constant 0 : index
      %c0_16 = arith.constant 0 : index
      %17 = vector.load %arg5[%c0_15, %c0_16] : memref<8x128xf32, #tpu.memory_space<vmem>>, vector<1x128xf32>
      tpu.vector_store %arg5[%c0_15, %c0_16], %16 {strides = array<i32>} : memref<8x128xf32, #tpu.memory_space<vmem>>, vector<1x128xf32>,
      %18 = arith.mulf %12, %12 : vector<128x128xf32>
      %cst_17 = arith.constant dense<0.000000e+00> : vector<128xf32>
      %19 = vector.multi_reduction <add>, %18, %cst_17 [0] : vector<128x128xf32> to vector<128xf32>
      %20 = vector.shape_cast %19 : vector<128xf32> to vector<1x128xf32>
      %c1 = arith.constant 1 : index
      %c0_18 = arith.constant 0 : index
      %21 = vector.load %arg5[%c1, %c0_18] : memref<8x128xf32, #tpu.memory_space<vmem>>, vector<1x128xf32>
      tpu.vector_store %arg5[%c1, %c0_18], %20 {strides = array<i32>} : memref<8x128xf32, #tpu.memory_space<vmem>>, vector<1x128xf32>,
    } else {
    }
    return
  }
  func.func @transform_0(%arg0: i32, %arg1: i32) -> (i32, i32) {
    %c0_i32 = arith.constant 0 : i32
    return %arg0, %arg1 : i32, i32
  }
  func.func @transform_1(%arg0: i32, %arg1: i32) -> (i32, i32) {
    %c0_i32 = arith.constant 0 : i32
    %c0_i32_0 = arith.constant 0 : i32
    return %arg1, %c0_i32 : i32, i32
  }
  func.func @transform_2(%arg0: i32, %arg1: i32) -> (i32, i32) {
    %c0_i32 = arith.constant 0 : i32
    %c0_i32_0 = arith.constant 0 : i32
    return %arg0, %c0_i32 : i32, i32
  }
  func.func @transform_3(%arg0: i32, %arg1: i32) -> (i32, i32) {
    %c0_i32 = arith.constant 0 : i32
    %c0_i32_0 = arith.constant 0 : i32
    return %arg0, %c0_i32 : i32, i32
  }
}

module attributes {stable_mosaic.version = 11 : i64} {
  func.func @_bn_res_act_kernel(%arg0: i32, %arg1: memref<128x128xbf16, #tpu.memory_space<vmem>>, %arg2: memref<1x128xf32, #tpu.memory_space<vmem>>, %arg3: memref<1x128xf32, #tpu.memory_space<vmem>>, %arg4: memref<128x128xbf16, #tpu.memory_space<vmem>>, %arg5: memref<1x128xf32, #tpu.memory_space<vmem>>, %arg6: memref<1x128xf32, #tpu.memory_space<vmem>>, %arg7: memref<128x128xf32, #tpu.memory_space<vmem>>) attributes {dimension_semantics = [#tpu.dimension_semantics<parallel>], iteration_bounds = array<i64: 1>, scalar_prefetch = 0 : i64, scratch_operands = 0 : i64, tpu.core_type = #tpu.core_type<tc>, window_params = [{transform_indices = @transform_0, window_bounds = array<i64: 128, 128>}, {pipeline_mode = #tpu.pipeline_mode<synchronous>, transform_indices = @transform_1, window_bounds = array<i64: 1, 128>}, {pipeline_mode = #tpu.pipeline_mode<synchronous>, transform_indices = @transform_2, window_bounds = array<i64: 1, 128>}, {transform_indices = @transform_3, window_bounds = array<i64: 128, 128>}, {pipeline_mode = #tpu.pipeline_mode<synchronous>, transform_indices = @transform_4, window_bounds = array<i64: 1, 128>}, {pipeline_mode = #tpu.pipeline_mode<synchronous>, transform_indices = @transform_5, window_bounds = array<i64: 1, 128>}, {transform_indices = @transform_6, window_bounds = array<i64: 128, 128>}]} {
    %c0 = arith.constant 0 : index
    %c0_0 = arith.constant 0 : index
    %0 = vector.load %arg1[%c0, %c0_0] : memref<128x128xbf16, #tpu.memory_space<vmem>>, vector<128x128xbf16>
    %1 = arith.extf %0 : vector<128x128xbf16> to vector<128x128xf32>
    %c0_1 = arith.constant 0 : index
    %c0_2 = arith.constant 0 : index
    %2 = vector.load %arg2[%c0_1, %c0_2] : memref<1x128xf32, #tpu.memory_space<vmem>>, vector<1x128xf32>
    %3 = vector.broadcast %2 : vector<1x128xf32> to vector<128x128xf32>
    %4 = arith.mulf %1, %3 : vector<128x128xf32>
    %c0_3 = arith.constant 0 : index
    %c0_4 = arith.constant 0 : index
    %5 = vector.load %arg3[%c0_3, %c0_4] : memref<1x128xf32, #tpu.memory_space<vmem>>, vector<1x128xf32>
    %6 = vector.broadcast %5 : vector<1x128xf32> to vector<128x128xf32>
    %7 = arith.addf %4, %6 : vector<128x128xf32>
    %c0_5 = arith.constant 0 : index
    %c0_6 = arith.constant 0 : index
    %8 = vector.load %arg4[%c0_5, %c0_6] : memref<128x128xbf16, #tpu.memory_space<vmem>>, vector<128x128xbf16>
    %9 = arith.extf %8 : vector<128x128xbf16> to vector<128x128xf32>
    %c0_7 = arith.constant 0 : index
    %c0_8 = arith.constant 0 : index
    %10 = vector.load %arg5[%c0_7, %c0_8] : memref<1x128xf32, #tpu.memory_space<vmem>>, vector<1x128xf32>
    %11 = vector.broadcast %10 : vector<1x128xf32> to vector<128x128xf32>
    %12 = arith.mulf %9, %11 : vector<128x128xf32>
    %c0_9 = arith.constant 0 : index
    %c0_10 = arith.constant 0 : index
    %13 = vector.load %arg6[%c0_9, %c0_10] : memref<1x128xf32, #tpu.memory_space<vmem>>, vector<1x128xf32>
    %14 = vector.broadcast %13 : vector<1x128xf32> to vector<128x128xf32>
    %15 = arith.addf %12, %14 : vector<128x128xf32>
    %16 = arith.addf %7, %15 : vector<128x128xf32>
    %cst = arith.constant 0.000000e+00 : f32
    %17 = vector.broadcast %cst : f32 to vector<128x128xf32>
    %18 = arith.cmpf oge, %16, %17 : vector<128x128xf32>
    %cst_11 = arith.constant 2.000000e-01 : f32
    %19 = vector.broadcast %cst_11 : f32 to vector<128x128xf32>
    %20 = arith.mulf %19, %16 : vector<128x128xf32>
    %21 = arith.select %18, %16, %20 : vector<128x128xi1>, vector<128x128xf32>
    %c0_12 = arith.constant 0 : index
    %c0_13 = arith.constant 0 : index
    %22 = vector.load %arg7[%c0_12, %c0_13] : memref<128x128xf32, #tpu.memory_space<vmem>>, vector<128x128xf32>
    tpu.vector_store %arg7[%c0_12, %c0_13], %21 {strides = array<i32>} : memref<128x128xf32, #tpu.memory_space<vmem>>, vector<128x128xf32>,
    return
  }
  func.func @transform_0(%arg0: i32) -> (i32, i32) {
    %c0_i32 = arith.constant 0 : i32
    %c0_i32_0 = arith.constant 0 : i32
    return %arg0, %c0_i32 : i32, i32
  }
  func.func @transform_1(%arg0: i32) -> (i32, i32) {
    %c0_i32 = arith.constant 0 : i32
    %c0_i32_0 = arith.constant 0 : i32
    %c0_i32_1 = arith.constant 0 : i32
    return %c0_i32, %c0_i32_0 : i32, i32
  }
  func.func @transform_2(%arg0: i32) -> (i32, i32) {
    %c0_i32 = arith.constant 0 : i32
    %c0_i32_0 = arith.constant 0 : i32
    %c0_i32_1 = arith.constant 0 : i32
    return %c0_i32, %c0_i32_0 : i32, i32
  }
  func.func @transform_3(%arg0: i32) -> (i32, i32) {
    %c0_i32 = arith.constant 0 : i32
    %c0_i32_0 = arith.constant 0 : i32
    return %arg0, %c0_i32 : i32, i32
  }
  func.func @transform_4(%arg0: i32) -> (i32, i32) {
    %c0_i32 = arith.constant 0 : i32
    %c0_i32_0 = arith.constant 0 : i32
    %c0_i32_1 = arith.constant 0 : i32
    return %c0_i32, %c0_i32_0 : i32, i32
  }
  func.func @transform_5(%arg0: i32) -> (i32, i32) {
    %c0_i32 = arith.constant 0 : i32
    %c0_i32_0 = arith.constant 0 : i32
    %c0_i32_1 = arith.constant 0 : i32
    return %c0_i32, %c0_i32_0 : i32, i32
  }
  func.func @transform_6(%arg0: i32) -> (i32, i32) {
    %c0_i32 = arith.constant 0 : i32
    %c0_i32_0 = arith.constant 0 : i32
    return %arg0, %c0_i32 : i32, i32
  }
}

</mosaic_0001>

<bundles_post_ra>
// kernel: residual_block_forward.5
= control target key start
LH: loop header
LB: loop body
LE: loop exit
PB: predicated region body
PF: predicated region fallthrough
CT: control target
= control target key end

     0   :  { %vm126_vm0 = vcmask 293888   ;;  %vm151_vm1 = vcmask 1041408   ;;  %s692_s1 = inlined_call_operand.vmem [shape: bf16[36,128], index: 1, kind: input, shape index: {}]   ;;  %s693_s0 = inlined_call_operand.vmem [shape: bf16[128,36], index: 0, kind: input, shape index: {}]   ;;  %s694_s2 = inlined_call_operand.vmem [shape: bf16[128,128], index: 2, kind: output, shape index: {0}]   ;;  %s695_s3 = inlined_call_operand.vmem [shape: f32[8,128], index: 3, kind: output, shape index: {1}]  }
   0x1   :  { %v590_v0 = vld [vmem:[%s692_s1] sm:$0xff]   ;;  %v591_v1 = vld [vmem:[%s692_s1 + $0x8] sm:$0xff]   ;;  %v592_v2 = vld [vmem:[%s692_s1 + $0x10] ss:$0 sps:$4 sm:$0x33]  }
   0x2   :  { %560 = vmatprep.subr.bf16.mxu0 %v590_v0  ;;  %v593_v3 = vld [vmem:[%s693_s0] sm:$0xff]   ;;  %582 = vmatprep.subr.bf16.mxu1 %v590_v0  ;;  %v153_v5 = vsel %vm151_vm1, %v592_v2, 0  ;;  %v594_v6 = vld [vmem:[%s693_s0 + $0x8] sm:$0xff]   ;;  %v595_v8 = vld [vmem:[%s693_s0 + $0x10] sm:$0xff]  }
   0x3   :  { %561 = vmatpush3.bf16.msra.mxu0 %v590_v0  ;;  %585 = vmatpush3.bf16.msra.mxu1 %v590_v0  ;;  %v597_v4 = vld [vmem:[%s693_s0 + $0x20] sm:$0xff]   ;;  %v598_v7 = vld [vmem:[%s693_s0 + $0x28] sm:$0xff]   ;;  %v599_v9 = vld [vmem:[%s693_s0 + $0x30] sm:$0xff]  }
   0x4   :  { %562 = vmatprep.subr.bf16.mxu0 %v591_v1  ;;  %566 = vmatprep.mubr.msk.bf16.mxu0 %vm126_vm0, %v593_v3  ;;  %v596_v10 = vld [vmem:[%s693_s0 + $0x18] sm:$0xff]  }
   0x5   :  { %583 = vmatprep.subr.bf16.mxu1 %v591_v1  ;;  %574 = vmatprep.mubr.msk.bf16.mxu1 %vm126_vm0, %v597_v4  ;;  %v600_v11 = vld [vmem:[%s693_s0 + $0x38] sm:$0xff]  }
   0x7   :  { %563 = vmatpush3.bf16.msra.mxu0 %v591_v1  ;;  %586 = vmatpush3.bf16.msra.mxu1 %v591_v1 }
   0x8   :  { %588 = vmatprep.subr.msk.bf16.mxu0 %vm151_vm1, %v592_v2  ;;  %589 = vmatprep.subr.msk.bf16.mxu1 %vm151_vm1, %v592_v2 }
   0xb   :  { %565 = vmatpush3.bf16.msra.mxu0 %v153_v5  ;;  %587 = vmatpush3.bf16.msra.mxu1 %v153_v5 }
   0xe   :  { %567 = vmatmul.mubr.msk.bf16.vlgmr.msra.gmra.mrb[0].mxu0 %vm126_vm0, %v594_v6  ;;  %575 = vmatmul.mubr.msk.bf16.vlgmr.msra.gmra.mrb[0].mxu1 %vm126_vm0, %v598_v7 }
   0xf   :  { %570 = vmatprep.mubr.msk.bf16.mxu0 %vm126_vm0, %v595_v8  ;;  %578 = vmatprep.mubr.msk.bf16.mxu1 %vm126_vm0, %v599_v9 }
  0x16   :  { %571 = vmatmul.mubr.msk.bf16.gmra.mrb[4].mxu0 %vm126_vm0, %v596_v10  ;;  %579 = vmatmul.mubr.msk.bf16.gmra.mrb[4].mxu1 %vm126_vm0, %v600_v11 }
  0xe1   :  { %v568_v12 = vpop.f32.mrb[0].mxu0  ;;  %v576_v13 = vpop.f32.mrb[0].mxu1 }
  0xe2   :  { %v189_v14 = vpop.f32.mrb[1].mxu0  ;;  %v221_v15 = vpop.f32.mrb[1].mxu1  ;;  %v407_v27 = vmul.f32 %v568_v12, %v568_v12  ;;  %v415_v63 = vmul.f32 %v576_v13, %v576_v13 }
  0xe3   :  { %v569_v16 = vpop.f32.mrb[2].mxu0  ;;  %v577_v17 = vpop.f32.mrb[2].mxu1  ;;  %v405_v18 = vmul.f32 %v189_v14, %v189_v14  ;;  %v413_v57 = vmul.f32 %v221_v15, %v221_v15 }
  0xe4   :  { %v510_v19 = vpack.c.bf16 %v569_v16, %v568_v12  ;;  %v192_v20 = vpop.f32.mrb[3].mxu0  ;;  %v530_v21 = vpack.c.bf16 %v577_v17, %v576_v13  ;;  %v224_v22 = vpop.f32.mrb[3].mxu1  ;;  %v408_v30 = vmul.f32 %v569_v16, %v569_v16  ;;  %v416_v2 = vmul.f32 %v577_v17, %v577_v17 }
  0xe5   :  { %v505_v23 = vpack.c.bf16 %v192_v20, %v189_v14  ;;  %v383_v24 = vadd.f32 %v192_v20, %v189_v14  ;;  %v406_v25 = vmul.f32 %v192_v20, %v192_v20  ;;  %v525_v26 = vpack.c.bf16 %v224_v22, %v221_v15 }
  0xe6   :  { %542 = vst [vmem:[%s694_s2 + $0x8] sm:$0xff] %v510_v19   ;;  %546 = vst [vmem:[%s694_s2 + $0x28] sm:$0xff] %v530_v21   ;;  %v414_v62 = vmul.f32 %v224_v22, %v224_v22 }
  0xe7   :  { %506 = vst [vmem:[%s694_s2] sm:$0xff] %v505_v23   ;;  %v384_v28 = vadd.f32 %v568_v12, %v383_v24  ;;  %v421_v29 = vadd.f32 %v406_v25, %v405_v18  ;;  %545 = vst [vmem:[%s694_s2 + $0x20] sm:$0xff] %v525_v26  }
  0xe9   :  { %v422_v31 = vadd.f32 %v421_v29, %v407_v27  ;;  %v572_v32 = vpop.f32.mrb[4].mxu0  ;;  %v385_v33 = vadd.f32 %v569_v16, %v384_v28  ;;  %v580_v34 = vpop.f32.mrb[4].mxu1 }
  0xea   :  { %v205_v35 = vpop.f32.mrb[5].mxu0  ;;  %v237_v36 = vpop.f32.mrb[5].mxu1  ;;  %v411_v51 = vmul.f32 %v572_v32, %v572_v32  ;;  %v419_v11 = vmul.f32 %v580_v34, %v580_v34 }
  0xeb   :  { %v386_v37 = vadd.f32 %v385_v33, %v205_v35  ;;  %v409_v38 = vmul.f32 %v205_v35, %v205_v35  ;;  %v423_v39 = vadd.f32 %v422_v31, %v408_v30  ;;  %v573_v40 = vpop.f32.mrb[6].mxu0  ;;  %v581_v41 = vpop.f32.mrb[6].mxu1  ;;  %v417_v5 = vmul.f32 %v237_v36, %v237_v36 }
  0xec   :  { %v520_v42 = vpack.c.bf16 %v573_v40, %v572_v32  ;;  %v208_v43 = vpop.f32.mrb[7].mxu0  ;;  %v540_v44 = vpack.c.bf16 %v581_v41, %v580_v34  ;;  %v240_v45 = vpop.f32.mrb[7].mxu1  ;;  %v412_v54 = vmul.f32 %v573_v40, %v573_v40 }
  0xed   :  { %v424_v46 = vadd.f32 %v423_v39, %v409_v38  ;;  %v515_v47 = vpack.c.bf16 %v208_v43, %v205_v35  ;;  %v387_v48 = vadd.f32 %v386_v37, %v208_v43  ;;  %v410_v49 = vmul.f32 %v208_v43, %v208_v43 }
  0xee   :  { %544 = vst [vmem:[%s694_s2 + $0x18] sm:$0xff] %v520_v42   ;;  %548 = vst [vmem:[%s694_s2 + $0x38] sm:$0xff] %v540_v44   ;;  %v535_v50 = vpack.c.bf16 %v240_v45, %v237_v36  ;;  %v418_v10 = vmul.f32 %v240_v45, %v240_v45 }
  0xef   :  { %543 = vst [vmem:[%s694_s2 + $0x10] sm:$0xff] %v515_v47   ;;  %v388_v52 = vadd.f32 %v572_v32, %v387_v48  ;;  %v425_v53 = vadd.f32 %v424_v46, %v410_v49 }
  0xf0   :  { %547 = vst [vmem:[%s694_s2 + $0x30] sm:$0xff] %v535_v50  }
  0xf1   :  { %v426_v55 = vadd.f32 %v425_v53, %v411_v51  ;;  %v389_v56 = vadd.f32 %v573_v40, %v388_v52 }
  0xf3   :  { %v390_v58 = vadd.f32 %v389_v56, %v221_v15  ;;  %v427_v59 = vadd.f32 %v426_v55, %v412_v54  ;;  %v420_v15 = vmul.f32 %v581_v41, %v581_v41 }
  0xf5   :  { %v428_v60 = vadd.f32 %v427_v59, %v413_v57  ;;  %v391_v61 = vadd.f32 %v390_v58, %v224_v22 }
  0xf7   :  { %v392_v0 = vadd.f32 %v576_v13, %v391_v61  ;;  %v429_v1 = vadd.f32 %v428_v60, %v414_v62 }
  0xf9   :  { %v430_v3 = vadd.f32 %v429_v1, %v415_v63  ;;  %v393_v4 = vadd.f32 %v577_v17, %v392_v0 }
  0xfb   :  { %v394_v6 = vadd.f32 %v393_v4, %v237_v36  ;;  %v431_v7 = vadd.f32 %v430_v3, %v416_v2 }
  0xfd   :  { %v432_v8 = vadd.f32 %v431_v7, %v417_v5  ;;  %v395_v9 = vadd.f32 %v394_v6, %v240_v45 }
  0xff   :  { %v396_v12 = vadd.f32 %v580_v34, %v395_v9  ;;  %v433_v14 = vadd.f32 %v432_v8, %v418_v10 }
 0x101   :  { %v397_v16 = vadd.f32 %v581_v41, %v396_v12  ;;  %v434_v18 = vadd.f32 %v433_v14, %v419_v11 }
 0x103   :  { %v398_v19 = vrot.slane %v397_v16, 4  ;;  %v435_v20 = vadd.f32 %v434_v18, %v420_v15 }
 0x105   :  { %v399_v21 = vadd.f32 %v398_v19, %v397_v16  ;;  %v436_v13 = vrot.slane %v435_v20, 4 }
 0x107   :  { %v400_v22 = vrot.slane %v399_v21, 2  ;;  %v437_v23 = vadd.f32 %v436_v13, %v435_v20 }
 0x109   :  { %v401_v24 = vadd.f32 %v400_v22, %v399_v21  ;;  %v438_v17 = vrot.slane %v437_v23, 2 }
 0x10b   :  { %v402_v25 = vrot.slane %v401_v24, 1  ;;  %v439_v26 = vadd.f32 %v438_v17, %v437_v23 }
 0x10d   :  { %v403_v27 = vadd.f32 %v402_v25, %v401_v24  ;;  %v440_v28 = vrot.slane %v439_v26, 1 }
 0x10f   :  { %404 = vst [vmem:[%s695_s3] sm:$0x1] %v403_v27  ;;  %v441_v29 = vadd.f32 %v440_v28, %v439_v26 }
 0x111   :  { %442 = vst [vmem:[%s695_s3 + $0x1] sm:$0x1] %v441_v29 }

// kernel: residual_block_forward.6
= control target key start
LH: loop header
LB: loop body
LE: loop exit
PB: predicated region body
PF: predicated region fallthrough
CT: control target
= control target key end

     0   :  { %s455_s0 = inlined_call_operand.vmem [shape: bf16[128,128], index: 0, kind: input, shape index: {}]   ;;  %s456_s1 = inlined_call_operand.vmem [shape: f32[1,128], index: 1, kind: input, shape index: {}]   ;;  %s457_s2 = inlined_call_operand.vmem [shape: f32[1,128], index: 2, kind: input, shape index: {}]   ;;  %s458_s3 = inlined_call_operand.vmem [shape: bf16[128,128], index: 3, kind: output, shape index: {}]  }
   0x1   :  { %v259_v0 = vld [vmem:[%s455_s0] sm:$0xff]   ;;  %v330_v4 = vld [vmem:[%s455_s0 + $0x8] sm:$0xff]   ;;  %v331_v5 = vld [vmem:[%s455_s0 + $0x10] sm:$0xff]  }
   0x2   :  { %v370_v1 = vld [vmem:[%s456_s1] ss:$0 sm:$0xff]  ;;  %v260_v2 = vunpack.c.l.bf16 %v259_v0  ;;  %v261_v3 = vunpack.c.h.bf16 %v259_v0  ;;  %v332_v6 = vld [vmem:[%s455_s0 + $0x18] sm:$0xff]   ;;  %v264_v8 = vunpack.c.l.bf16 %v330_v4  ;;  %v265_v9 = vunpack.c.h.bf16 %v330_v4  ;;  %v334_v35 = vld [vmem:[%s455_s0 + $0x28] sm:$0xff]  }
   0x3   :  { %v384_v7 = vld [vmem:[%s457_s2] ss:$0 sm:$0xff]  ;;  %v268_v10 = vunpack.c.l.bf16 %v331_v5  ;;  %v269_v11 = vunpack.c.h.bf16 %v331_v5  ;;  %v272_v14 = vunpack.c.l.bf16 %v332_v6  ;;  %v273_v15 = vunpack.c.h.bf16 %v332_v6  ;;  %v335_v48 = vld [vmem:[%s455_s0 + $0x30] sm:$0xff]   ;;  %v336_v4 = vld [vmem:[%s455_s0 + $0x38] sm:$0xff]  }
   0x4   :  { %v53_v12 = vmul.f32 %v260_v2, %v370_v1  ;;  %v54_v13 = vmul.f32 %v261_v3, %v370_v1  ;;  %v55_v16 = vmul.f32 %v264_v8, %v370_v1  ;;  %v56_v17 = vmul.f32 %v265_v9, %v370_v1  ;;  %v333_v34 = vld [vmem:[%s455_s0 + $0x20] sm:$0xff]  }
   0x5   :  { %v57_v18 = vmul.f32 %v268_v10, %v370_v1  ;;  %v58_v19 = vmul.f32 %v269_v11, %v370_v1  ;;  %v59_v22 = vmul.f32 %v272_v14, %v370_v1  ;;  %v60_v23 = vmul.f32 %v273_v15, %v370_v1 }
   0x6   :  { %v76_v20 = vadd.f32 %v384_v7, %v53_v12  ;;  %v77_v21 = vadd.f32 %v384_v7, %v54_v13  ;;  %v78_v24 = vadd.f32 %v384_v7, %v55_v16  ;;  %v79_v25 = vadd.f32 %v384_v7, %v56_v17 }
   0x7   :  { %v80_v26 = vadd.f32 %v384_v7, %v57_v18  ;;  %v81_v27 = vadd.f32 %v384_v7, %v58_v19  ;;  %v82_v42 = vadd.f32 %v384_v7, %v59_v22  ;;  %v83_v43 = vadd.f32 %v384_v7, %v60_v23 }
   0x8   :  { %vm92_vm0 = vcmp.ge.f32.partialorder %v76_v20, 0.0  ;;  %vm93_vm1 = vcmp.ge.f32.partialorder %v77_v21, 0.0  ;;  %v108_v28 = vmul.f32 0.2, %v76_v20  ;;  %v109_v29 = vmul.f32 0.2, %v77_v21 }
   0x9   :  { %vm94_vm2 = vcmp.ge.f32.partialorder %v78_v24, 0.0  ;;  %vm95_vm3 = vcmp.ge.f32.partialorder %v79_v25, 0.0  ;;  %v110_v30 = vmul.f32 0.2, %v78_v24  ;;  %v111_v31 = vmul.f32 0.2, %v79_v25 }
   0xa   :  { %v124_v32 = vsel %vm92_vm0, %v76_v20, %v108_v28  ;;  %v125_v33 = vsel %vm93_vm1, %v77_v21, %v109_v29  ;;  %vm96_vm4 = vcmp.ge.f32.partialorder %v80_v26, 0.0  ;;  %vm97_vm5 = vcmp.ge.f32.partialorder %v81_v27, 0.0 }
   0xb   :  { %v293_v36 = vpack.c.bf16 %v125_v33, %v124_v32  ;;  %v126_v37 = vsel %vm94_vm2, %v78_v24, %v110_v30  ;;  %v127_v38 = vsel %vm95_vm3, %v79_v25, %v111_v31  ;;  %v112_v39 = vmul.f32 0.2, %v80_v26 }
   0xc   :  { %v298_v40 = vpack.c.bf16 %v127_v38, %v126_v37  ;;  %v113_v41 = vmul.f32 0.2, %v81_v27  ;;  %v276_v45 = vunpack.c.l.bf16 %v333_v34  ;;  %v277_v46 = vunpack.c.h.bf16 %v333_v34 }
   0xd   :  { %294 = vst [vmem:[%s458_s3] sm:$0xff] %v293_v36   ;;  %v128_v44 = vsel %vm96_vm4, %v80_v26, %v112_v39  ;;  %v280_v47 = vunpack.c.l.bf16 %v334_v35  ;;  %vm98_vm6 = vcmp.ge.f32.partialorder %v82_v42, 0.0  ;;  %vm99_vm7 = vcmp.ge.f32.partialorder %v83_v43, 0.0 }
   0xe   :  { %337 = vst [vmem:[%s458_s3 + $0x8] sm:$0xff] %v298_v40   ;;  %v129_v49 = vsel %vm97_vm5, %v81_v27, %v113_v41  ;;  %v114_v50 = vmul.f32 0.2, %v82_v42  ;;  %v115_v52 = vmul.f32 0.2, %v83_v43  ;;  %v61_v53 = vmul.f32 %v276_v45, %v370_v1 }
   0xf   :  { %v303_v51 = vpack.c.bf16 %v129_v49, %v128_v44  ;;  %v62_v54 = vmul.f32 %v277_v46, %v370_v1  ;;  %v281_v56 = vunpack.c.h.bf16 %v334_v35  ;;  %v63_v57 = vmul.f32 %v280_v47, %v370_v1 }
  0x10   :  { %v130_v55 = vsel %vm98_vm6, %v82_v42, %v114_v50  ;;  %v284_v58 = vunpack.c.l.bf16 %v335_v48  ;;  %v131_v59 = vsel %vm99_vm7, %v83_v43, %v115_v52  ;;  %v84_v60 = vadd.f32 %v384_v7, %v61_v53 }
  0x11   :  { %338 = vst [vmem:[%s458_s3 + $0x10] sm:$0xff] %v303_v51   ;;  %v85_v61 = vadd.f32 %v384_v7, %v62_v54  ;;  %v285_v62 = vunpack.c.h.bf16 %v335_v48  ;;  %v308_v63 = vpack.c.bf16 %v131_v59, %v130_v55  ;;  %v64_v0 = vmul.f32 %v281_v56, %v370_v1 }
  0x12   :  { %v86_v2 = vadd.f32 %v384_v7, %v63_v57  ;;  %v65_v3 = vmul.f32 %v284_v58, %v370_v1  ;;  %vm100_vm8 = vcmp.ge.f32.partialorder %v84_v60, 0.0  ;;  %v116_v5 = vmul.f32 0.2, %v84_v60 }
  0x13   :  { %vm101_vm9 = vcmp.ge.f32.partialorder %v85_v61, 0.0  ;;  %v117_v6 = vmul.f32 0.2, %v85_v61  ;;  %339 = vst [vmem:[%s458_s3 + $0x18] sm:$0xff] %v308_v63   ;;  %v87_v8 = vadd.f32 %v384_v7, %v64_v0  ;;  %v66_v10 = vmul.f32 %v285_v62, %v370_v1 }
  0x14   :  { %vm102_vm10 = vcmp.ge.f32.partialorder %v86_v2, 0.0  ;;  %v118_v9 = vmul.f32 0.2, %v86_v2  ;;  %v132_v11 = vsel %vm100_vm8, %v84_v60, %v116_v5  ;;  %v88_v13 = vadd.f32 %v384_v7, %v65_v3 }
  0x15   :  { %v133_v12 = vsel %vm101_vm9, %v85_v61, %v117_v6  ;;  %v288_v14 = vunpack.c.l.bf16 %v336_v4  ;;  %vm103_vm11 = vcmp.ge.f32.partialorder %v87_v8, 0.0  ;;  %v119_v16 = vmul.f32 0.2, %v87_v8 }
  0x16   :  { %v313_v15 = vpack.c.bf16 %v133_v12, %v132_v11  ;;  %v134_v17 = vsel %vm102_vm10, %v86_v2, %v118_v9  ;;  %v89_v18 = vadd.f32 %v384_v7, %v66_v10  ;;  %vm104_vm12 = vcmp.ge.f32.partialorder %v88_v13, 0.0 }
  0x17   :  { %v120_v19 = vmul.f32 0.2, %v88_v13  ;;  %v289_v20 = vunpack.c.h.bf16 %v336_v4  ;;  %v135_v21 = vsel %vm103_vm11, %v87_v8, %v119_v16  ;;  %v67_v22 = vmul.f32 %v288_v14, %v370_v1 }
  0x18   :  { %340 = vst [vmem:[%s458_s3 + $0x20] sm:$0xff] %v313_v15   ;;  %v318_v23 = vpack.c.bf16 %v135_v21, %v134_v17  ;;  %vm105_vm13 = vcmp.ge.f32.partialorder %v89_v18, 0.0  ;;  %v121_v24 = vmul.f32 0.2, %v89_v18 }
  0x19   :  { %v136_v25 = vsel %vm104_vm12, %v88_v13, %v120_v19  ;;  %v68_v26 = vmul.f32 %v289_v20, %v370_v1  ;;  %v90_v27 = vadd.f32 %v384_v7, %v67_v22 }
  0x1a   :  { %341 = vst [vmem:[%s458_s3 + $0x28] sm:$0xff] %v318_v23   ;;  %v137_v28 = vsel %vm105_vm13, %v89_v18, %v121_v24 }
  0x1b   :  { %v323_v29 = vpack.c.bf16 %v137_v28, %v136_v25  ;;  %v91_v30 = vadd.f32 %v384_v7, %v68_v26  ;;  %vm106_vm14 = vcmp.ge.f32.partialorder %v90_v27, 0.0  ;;  %v122_v31 = vmul.f32 0.2, %v90_v27 }
  0x1d   :  { %342 = vst [vmem:[%s458_s3 + $0x30] sm:$0xff] %v323_v29   ;;  %vm107_vm15 = vcmp.ge.f32.partialorder %v91_v30, 0.0  ;;  %v123_v32 = vmul.f32 0.2, %v91_v30  ;;  %v138_v33 = vsel %vm106_vm14, %v90_v27, %v122_v31 }
  0x1f   :  { %v139_v1 = vsel %vm107_vm15, %v91_v30, %v123_v32 }
  0x20   :  { %v328_v34 = vpack.c.bf16 %v139_v1, %v138_v33 }
  0x22   :  { %343 = vst [vmem:[%s458_s3 + $0x38] sm:$0xff] %v328_v34  }

// kernel: residual_block_forward.8
= control target key start
LH: loop header
LB: loop body
LE: loop exit
PB: predicated region body
PF: predicated region fallthrough
CT: control target
= control target key end

     0   :  { %vm142_vm0 = vcmask 588800   ;;  %vm167_vm1 = vcmask 1043456   ;;  %s728_s1 = inlined_call_operand.vmem [shape: bf16[72,128], index: 1, kind: input, shape index: {}]   ;;  %s729_s0 = inlined_call_operand.vmem [shape: bf16[128,72], index: 0, kind: input, shape index: {}]   ;;  %s730_s2 = inlined_call_operand.vmem [shape: bf16[128,128], index: 2, kind: output, shape index: {0}]   ;;  %s731_s3 = inlined_call_operand.vmem [shape: f32[8,128], index: 3, kind: output, shape index: {1}]  }
   0x1   :  { %v618_v0 = vld [vmem:[%s728_s1] sm:$0xff]   ;;  %v619_v1 = vld [vmem:[%s728_s1 + $0x8] sm:$0xff]   ;;  %v620_v2 = vld [vmem:[%s728_s1 + $0x10] sm:$0xff]  }
   0x2   :  { %580 = vmatprep.subr.bf16.mxu0 %v618_v0  ;;  %606 = vmatprep.subr.bf16.mxu1 %v618_v0  ;;  %v623_v3 = vld [vmem:[%s729_s0] sm:$0xff]   ;;  %v621_v4 = vld [vmem:[%s728_s1 + $0x18] sm:$0xff]   ;;  %v624_v8 = vld [vmem:[%s729_s0 + $0x8] sm:$0xff]  }
   0x3   :  { %581 = vmatpush3.bf16.msra.mxu0 %v618_v0  ;;  %611 = vmatpush3.bf16.msra.mxu1 %v618_v0  ;;  %v627_v5 = vld [vmem:[%s729_s0 + $0x20] sm:$0xff]   ;;  %v628_v9 = vld [vmem:[%s729_s0 + $0x28] sm:$0xff]   ;;  %v625_v10 = vld [vmem:[%s729_s0 + $0x10] sm:$0xff]  }
   0x4   :  { %582 = vmatprep.subr.bf16.mxu0 %v619_v1  ;;  %607 = vmatprep.subr.bf16.mxu1 %v619_v1  ;;  %v622_v6 = vld [vmem:[%s728_s1 + $0x20] ss:$0 sps:$4 sm:$0xff]   ;;  %v629_v11 = vld [vmem:[%s729_s0 + $0x30] sm:$0xff]   ;;  %v626_v12 = vld [vmem:[%s729_s0 + $0x18] sm:$0xff]  }
   0x5   :  { %590 = vmatprep.mubr.msk.bf16.mxu0 %vm142_vm0, %v623_v3  ;;  %598 = vmatprep.mubr.msk.bf16.mxu1 %vm142_vm0, %v627_v5  ;;  %v169_v7 = vsel %vm167_vm1, %v622_v6, 0  ;;  %v630_v13 = vld [vmem:[%s729_s0 + $0x38] sm:$0xff]  }
   0x7   :  { %583 = vmatpush3.bf16.msra.mxu0 %v619_v1  ;;  %612 = vmatpush3.bf16.msra.mxu1 %v619_v1 }
   0x8   :  { %584 = vmatprep.subr.bf16.mxu0 %v620_v2  ;;  %608 = vmatprep.subr.bf16.mxu1 %v620_v2 }
   0xb   :  { %585 = vmatpush3.bf16.msra.mxu0 %v620_v2  ;;  %613 = vmatpush3.bf16.msra.mxu1 %v620_v2 }
   0xc   :  { %586 = vmatprep.subr.bf16.mxu0 %v621_v4  ;;  %609 = vmatprep.subr.bf16.mxu1 %v621_v4 }
   0xf   :  { %587 = vmatpush3.bf16.msra.mxu0 %v621_v4  ;;  %614 = vmatpush3.bf16.msra.mxu1 %v621_v4 }
  0x10   :  { %616 = vmatprep.subr.msk.bf16.mxu0 %vm167_vm1, %v622_v6  ;;  %617 = vmatprep.subr.msk.bf16.mxu1 %vm167_vm1, %v622_v6 }
  0x13   :  { %589 = vmatpush3.bf16.msra.mxu0 %v169_v7  ;;  %615 = vmatpush3.bf16.msra.mxu1 %v169_v7 }
  0x16   :  { %591 = vmatmul.mubr.msk.bf16.vlgmr.msra.gmra.mrb[0].mxu0 %vm142_vm0, %v624_v8  ;;  %599 = vmatmul.mubr.msk.bf16.vlgmr.msra.gmra.mrb[0].mxu1 %vm142_vm0, %v628_v9 }
  0x17   :  { %594 = vmatprep.mubr.msk.bf16.mxu0 %vm142_vm0, %v625_v10  ;;  %602 = vmatprep.mubr.msk.bf16.mxu1 %vm142_vm0, %v629_v11 }
  0x1e   :  { %595 = vmatmul.mubr.msk.bf16.gmra.mrb[4].mxu0 %vm142_vm0, %v626_v12  ;;  %603 = vmatmul.mubr.msk.bf16.gmra.mrb[4].mxu1 %vm142_vm0, %v630_v13 }
  0xe9   :  { %v592_v14 = vpop.f32.mrb[0].mxu0  ;;  %v600_v15 = vpop.f32.mrb[0].mxu1 }
  0xea   :  { %v205_v16 = vpop.f32.mrb[1].mxu0  ;;  %v237_v17 = vpop.f32.mrb[1].mxu1  ;;  %v423_v29 = vmul.f32 %v592_v14, %v592_v14  ;;  %v431_v1 = vmul.f32 %v600_v15, %v600_v15 }
  0xeb   :  { %v593_v18 = vpop.f32.mrb[2].mxu0  ;;  %v601_v19 = vpop.f32.mrb[2].mxu1  ;;  %v421_v20 = vmul.f32 %v205_v16, %v205_v16  ;;  %v429_v59 = vmul.f32 %v237_v17, %v237_v17 }
  0xec   :  { %v528_v21 = vpack.c.bf16 %v593_v18, %v592_v14  ;;  %v208_v22 = vpop.f32.mrb[3].mxu0  ;;  %v548_v23 = vpack.c.bf16 %v601_v19, %v600_v15  ;;  %v240_v24 = vpop.f32.mrb[3].mxu1  ;;  %v424_v32 = vmul.f32 %v593_v18, %v593_v18  ;;  %v432_v4 = vmul.f32 %v601_v19, %v601_v19 }
  0xed   :  { %v523_v25 = vpack.c.bf16 %v208_v22, %v205_v16  ;;  %v399_v26 = vadd.f32 %v208_v22, %v205_v16  ;;  %v422_v27 = vmul.f32 %v208_v22, %v208_v22  ;;  %v543_v28 = vpack.c.bf16 %v240_v24, %v237_v17 }
  0xee   :  { %560 = vst [vmem:[%s730_s2 + $0x8] sm:$0xff] %v528_v21   ;;  %564 = vst [vmem:[%s730_s2 + $0x28] sm:$0xff] %v548_v23   ;;  %v430_v0 = vmul.f32 %v240_v24, %v240_v24 }
  0xef   :  { %524 = vst [vmem:[%s730_s2] sm:$0xff] %v523_v25   ;;  %v400_v30 = vadd.f32 %v592_v14, %v399_v26  ;;  %v437_v31 = vadd.f32 %v422_v27, %v421_v20  ;;  %563 = vst [vmem:[%s730_s2 + $0x20] sm:$0xff] %v543_v28  }
  0xf1   :  { %v438_v33 = vadd.f32 %v437_v31, %v423_v29  ;;  %v596_v34 = vpop.f32.mrb[4].mxu0  ;;  %v401_v35 = vadd.f32 %v593_v18, %v400_v30  ;;  %v604_v36 = vpop.f32.mrb[4].mxu1 }
  0xf2   :  { %v221_v37 = vpop.f32.mrb[5].mxu0  ;;  %v253_v38 = vpop.f32.mrb[5].mxu1  ;;  %v427_v53 = vmul.f32 %v596_v34, %v596_v34  ;;  %v435_v13 = vmul.f32 %v604_v36, %v604_v36 }
  0xf3   :  { %v402_v39 = vadd.f32 %v401_v35, %v221_v37  ;;  %v425_v40 = vmul.f32 %v221_v37, %v221_v37  ;;  %v439_v41 = vadd.f32 %v438_v33, %v424_v32  ;;  %v597_v42 = vpop.f32.mrb[6].mxu0  ;;  %v605_v43 = vpop.f32.mrb[6].mxu1  ;;  %v433_v7 = vmul.f32 %v253_v38, %v253_v38 }
  0xf4   :  { %v538_v44 = vpack.c.bf16 %v597_v42, %v596_v34  ;;  %v224_v45 = vpop.f32.mrb[7].mxu0  ;;  %v558_v46 = vpack.c.bf16 %v605_v43, %v604_v36  ;;  %v256_v47 = vpop.f32.mrb[7].mxu1  ;;  %v428_v56 = vmul.f32 %v597_v42, %v597_v42 }
  0xf5   :  { %v440_v48 = vadd.f32 %v439_v41, %v425_v40  ;;  %v533_v49 = vpack.c.bf16 %v224_v45, %v221_v37  ;;  %v403_v50 = vadd.f32 %v402_v39, %v224_v45  ;;  %v426_v51 = vmul.f32 %v224_v45, %v224_v45 }
  0xf6   :  { %562 = vst [vmem:[%s730_s2 + $0x18] sm:$0xff] %v538_v44   ;;  %566 = vst [vmem:[%s730_s2 + $0x38] sm:$0xff] %v558_v46   ;;  %v553_v52 = vpack.c.bf16 %v256_v47, %v253_v38  ;;  %v434_v12 = vmul.f32 %v256_v47, %v256_v47 }
  0xf7   :  { %561 = vst [vmem:[%s730_s2 + $0x10] sm:$0xff] %v533_v49   ;;  %v404_v54 = vadd.f32 %v596_v34, %v403_v50  ;;  %v441_v55 = vadd.f32 %v440_v48, %v426_v51 }
  0xf8   :  { %565 = vst [vmem:[%s730_s2 + $0x30] sm:$0xff] %v553_v52  }
  0xf9   :  { %v442_v57 = vadd.f32 %v441_v55, %v427_v53  ;;  %v405_v58 = vadd.f32 %v597_v42, %v404_v54 }
  0xfb   :  { %v406_v60 = vadd.f32 %v405_v58, %v237_v17  ;;  %v443_v61 = vadd.f32 %v442_v57, %v428_v56  ;;  %v436_v17 = vmul.f32 %v605_v43, %v605_v43 }
  0xfd   :  { %v444_v62 = vadd.f32 %v443_v61, %v429_v59  ;;  %v407_v63 = vadd.f32 %v406_v60, %v240_v24 }
  0xff   :  { %v408_v2 = vadd.f32 %v600_v15, %v407_v63  ;;  %v445_v3 = vadd.f32 %v444_v62, %v430_v0 }
 0x101   :  { %v446_v5 = vadd.f32 %v445_v3, %v431_v1  ;;  %v409_v6 = vadd.f32 %v601_v19, %v408_v2 }
 0x103   :  { %v410_v8 = vadd.f32 %v409_v6, %v253_v38  ;;  %v447_v9 = vadd.f32 %v446_v5, %v432_v4 }
 0x105   :  { %v448_v10 = vadd.f32 %v447_v9, %v433_v7  ;;  %v411_v11 = vadd.f32 %v410_v8, %v256_v47 }
 0x107   :  { %v412_v14 = vadd.f32 %v604_v36, %v411_v11  ;;  %v449_v16 = vadd.f32 %v448_v10, %v434_v12 }
 0x109   :  { %v413_v18 = vadd.f32 %v605_v43, %v412_v14  ;;  %v450_v20 = vadd.f32 %v449_v16, %v435_v13 }
 0x10b   :  { %v414_v21 = vrot.slane %v413_v18, 4  ;;  %v451_v22 = vadd.f32 %v450_v20, %v436_v17 }
 0x10d   :  { %v415_v23 = vadd.f32 %v414_v21, %v413_v18  ;;  %v452_v15 = vrot.slane %v451_v22, 4 }
 0x10f   :  { %v416_v24 = vrot.slane %v415_v23, 2  ;;  %v453_v25 = vadd.f32 %v452_v15, %v451_v22 }
 0x111   :  { %v417_v26 = vadd.f32 %v416_v24, %v415_v23  ;;  %v454_v19 = vrot.slane %v453_v25, 2 }
 0x113   :  { %v418_v27 = vrot.slane %v417_v26, 1  ;;  %v455_v28 = vadd.f32 %v454_v19, %v453_v25 }
 0x115   :  { %v419_v29 = vadd.f32 %v418_v27, %v417_v26  ;;  %v456_v30 = vrot.slane %v455_v28, 1 }
 0x117   :  { %420 = vst [vmem:[%s731_s3] sm:$0x1] %v419_v29  ;;  %v457_v31 = vadd.f32 %v456_v30, %v455_v28 }
 0x119   :  { %458 = vst [vmem:[%s731_s3 + $0x1] sm:$0x1] %v457_v31 }

// kernel: residual_block_forward.7
= control target key start
LH: loop header
LB: loop body
LE: loop exit
PB: predicated region body
PF: predicated region fallthrough
CT: control target
= control target key end

     0   :  { %vm132_vm0 = vcmask 1041408   ;;  %vm107_vm1 = vcmask 31744   ;;  %s651_s1 = inlined_call_operand.vmem [shape: bf16[4,128], index: 1, kind: input, shape index: {}]   ;;  %s652_s0 = inlined_call_operand.vmem [shape: bf16[128,4], index: 0, kind: input, shape index: {}]   ;;  %s653_s2 = inlined_call_operand.vmem [shape: bf16[128,128], index: 2, kind: output, shape index: {0}]   ;;  %s654_s3 = inlined_call_operand.vmem [shape: f32[8,128], index: 3, kind: output, shape index: {1}]  }
   0x1   :  { %v66_v0 = vld [vmem:[%s651_s1] sm:$0x3]  ;;  %v559_v3 = vld [vmem:[%s652_s0 + $0x8] sm:$0xff]   ;;  %v560_v4 = vld [vmem:[%s652_s0 + $0x10] sm:$0xff]  }
   0x2   :  { %556 = vmatprep.subr.msk.bf16.mxu0 %vm132_vm0, %v66_v0  ;;  %v134_v1 = vsel %vm132_vm0, %v66_v0, 0  ;;  %v558_v2 = vld [vmem:[%s652_s0] sm:$0xff]   ;;  %557 = vmatprep.subr.msk.bf16.mxu1 %vm132_vm0, %v66_v0  ;;  %v563_v6 = vld [vmem:[%s652_s0 + $0x28] sm:$0xff]   ;;  %v564_v7 = vld [vmem:[%s652_s0 + $0x30] sm:$0xff]  }
   0x3   :  { %537 = vmatpush3.bf16.msra.mxu0 %v134_v1  ;;  %555 = vmatpush3.bf16.msra.mxu1 %v134_v1  ;;  %v562_v5 = vld [vmem:[%s652_s0 + $0x20] sm:$0xff]   ;;  %v561_v8 = vld [vmem:[%s652_s0 + $0x18] sm:$0xff]  }
   0x4   :  { %538 = vmatprep.mubr.msk.bf16.mxu0 %vm107_vm1, %v558_v2  ;;  %546 = vmatprep.mubr.msk.bf16.mxu1 %vm107_vm1, %v562_v5  ;;  %v565_v9 = vld [vmem:[%s652_s0 + $0x38] sm:$0xff]  }
   0x6   :  { %539 = vmatmul.mubr.msk.bf16.vlgmr.msra.gmra.mrb[0].mxu0 %vm107_vm1, %v559_v3  ;;  %547 = vmatmul.mubr.msk.bf16.vlgmr.msra.gmra.mrb[0].mxu1 %vm107_vm1, %v563_v6 }
   0x7   :  { %542 = vmatprep.mubr.msk.bf16.mxu0 %vm107_vm1, %v560_v4  ;;  %550 = vmatprep.mubr.msk.bf16.mxu1 %vm107_vm1, %v564_v7 }
   0xe   :  { %543 = vmatmul.mubr.msk.bf16.gmra.mrb[4].mxu0 %vm107_vm1, %v561_v8  ;;  %551 = vmatmul.mubr.msk.bf16.gmra.mrb[4].mxu1 %vm107_vm1, %v565_v9 }
  0xd9   :  { %v540_v10 = vpop.f32.mrb[0].mxu0  ;;  %v548_v15 = vpop.f32.mrb[0].mxu1 }
  0xda   :  { %v170_v11 = vpop.f32.mrb[1].mxu0  ;;  %v202_v20 = vpop.f32.mrb[1].mxu1  ;;  %v388_v22 = vmul.f32 %v540_v10, %v540_v10  ;;  %v396_v61 = vmul.f32 %v548_v15, %v548_v15 }
  0xdb   :  { %v541_v12 = vpop.f32.mrb[2].mxu0  ;;  %v386_v16 = vmul.f32 %v170_v11, %v170_v11  ;;  %v549_v21 = vpop.f32.mrb[2].mxu1  ;;  %v394_v55 = vmul.f32 %v202_v20, %v202_v20 }
  0xdc   :  { %v488_v13 = vpack.c.bf16 %v541_v12, %v540_v10  ;;  %v173_v14 = vpop.f32.mrb[3].mxu0  ;;  %v508_v25 = vpack.c.bf16 %v549_v21, %v548_v15  ;;  %v205_v26 = vpop.f32.mrb[3].mxu1  ;;  %v389_v28 = vmul.f32 %v541_v12, %v541_v12  ;;  %v397_v0 = vmul.f32 %v549_v21, %v549_v21 }
  0xdd   :  { %v483_v17 = vpack.c.bf16 %v173_v14, %v170_v11  ;;  %v364_v18 = vadd.f32 %v173_v14, %v170_v11  ;;  %v387_v19 = vmul.f32 %v173_v14, %v173_v14  ;;  %v503_v27 = vpack.c.bf16 %v205_v26, %v202_v20 }
  0xde   :  { %520 = vst [vmem:[%s653_s2 + $0x8] sm:$0xff] %v488_v13   ;;  %524 = vst [vmem:[%s653_s2 + $0x28] sm:$0xff] %v508_v25   ;;  %v395_v60 = vmul.f32 %v205_v26, %v205_v26 }
  0xdf   :  { %484 = vst [vmem:[%s653_s2] sm:$0xff] %v483_v17   ;;  %v365_v23 = vadd.f32 %v540_v10, %v364_v18  ;;  %v402_v24 = vadd.f32 %v387_v19, %v386_v16  ;;  %523 = vst [vmem:[%s653_s2 + $0x20] sm:$0xff] %v503_v27  }
  0xe1   :  { %v403_v29 = vadd.f32 %v402_v24, %v388_v22  ;;  %v544_v30 = vpop.f32.mrb[4].mxu0  ;;  %v366_v31 = vadd.f32 %v541_v12, %v365_v23  ;;  %v552_v39 = vpop.f32.mrb[4].mxu1 }
  0xe2   :  { %v186_v32 = vpop.f32.mrb[5].mxu0  ;;  %v218_v44 = vpop.f32.mrb[5].mxu1  ;;  %v392_v46 = vmul.f32 %v544_v30, %v544_v30  ;;  %v400_v9 = vmul.f32 %v552_v39, %v552_v39 }
  0xe3   :  { %v367_v33 = vadd.f32 %v366_v31, %v186_v32  ;;  %v390_v34 = vmul.f32 %v186_v32, %v186_v32  ;;  %v404_v35 = vadd.f32 %v403_v29, %v389_v28  ;;  %v545_v36 = vpop.f32.mrb[6].mxu0  ;;  %v553_v45 = vpop.f32.mrb[6].mxu1  ;;  %v398_v3 = vmul.f32 %v218_v44, %v218_v44 }
  0xe4   :  { %v498_v37 = vpack.c.bf16 %v545_v36, %v544_v30  ;;  %v189_v38 = vpop.f32.mrb[7].mxu0  ;;  %v518_v49 = vpack.c.bf16 %v553_v45, %v552_v39  ;;  %v221_v50 = vpop.f32.mrb[7].mxu1  ;;  %v393_v52 = vmul.f32 %v545_v36, %v545_v36  ;;  %v401_v12 = vmul.f32 %v553_v45, %v553_v45 }
  0xe5   :  { %v405_v40 = vadd.f32 %v404_v35, %v390_v34  ;;  %v493_v41 = vpack.c.bf16 %v189_v38, %v186_v32  ;;  %v368_v42 = vadd.f32 %v367_v33, %v189_v38  ;;  %v391_v43 = vmul.f32 %v189_v38, %v189_v38 }
  0xe6   :  { %522 = vst [vmem:[%s653_s2 + $0x18] sm:$0xff] %v498_v37   ;;  %v513_v51 = vpack.c.bf16 %v221_v50, %v218_v44  ;;  %526 = vst [vmem:[%s653_s2 + $0x38] sm:$0xff] %v518_v49   ;;  %v399_v8 = vmul.f32 %v221_v50, %v221_v50 }
  0xe7   :  { %521 = vst [vmem:[%s653_s2 + $0x10] sm:$0xff] %v493_v41   ;;  %v369_v47 = vadd.f32 %v544_v30, %v368_v42  ;;  %v406_v48 = vadd.f32 %v405_v40, %v391_v43 }
  0xe8   :  { %525 = vst [vmem:[%s653_s2 + $0x30] sm:$0xff] %v513_v51  }
  0xe9   :  { %v407_v53 = vadd.f32 %v406_v48, %v392_v46  ;;  %v370_v54 = vadd.f32 %v545_v36, %v369_v47 }
  0xeb   :  { %v371_v56 = vadd.f32 %v370_v54, %v202_v20  ;;  %v408_v57 = vadd.f32 %v407_v53, %v393_v52 }
  0xed   :  { %v409_v58 = vadd.f32 %v408_v57, %v394_v55  ;;  %v372_v59 = vadd.f32 %v371_v56, %v205_v26 }
  0xef   :  { %v373_v62 = vadd.f32 %v548_v15, %v372_v59  ;;  %v410_v63 = vadd.f32 %v409_v58, %v395_v60 }
  0xf1   :  { %v411_v1 = vadd.f32 %v410_v63, %v396_v61  ;;  %v374_v2 = vadd.f32 %v549_v21, %v373_v62 }
  0xf3   :  { %v375_v4 = vadd.f32 %v374_v2, %v218_v44  ;;  %v412_v5 = vadd.f32 %v411_v1, %v397_v0 }
  0xf5   :  { %v413_v6 = vadd.f32 %v412_v5, %v398_v3  ;;  %v376_v7 = vadd.f32 %v375_v4, %v221_v50 }
  0xf7   :  { %v377_v10 = vadd.f32 %v552_v39, %v376_v7  ;;  %v414_v11 = vadd.f32 %v413_v6, %v399_v8 }
  0xf9   :  { %v378_v13 = vadd.f32 %v553_v45, %v377_v10  ;;  %v415_v14 = vadd.f32 %v414_v11, %v400_v9 }
  0xfb   :  { %v379_v16 = vrot.slane %v378_v13, 4  ;;  %v416_v17 = vadd.f32 %v415_v14, %v401_v12 }
  0xfd   :  { %v380_v18 = vadd.f32 %v379_v16, %v378_v13  ;;  %v417_v15 = vrot.slane %v416_v17, 4 }
  0xff   :  { %v381_v19 = vrot.slane %v380_v18, 2  ;;  %v418_v20 = vadd.f32 %v417_v15, %v416_v17 }
 0x101   :  { %v382_v22 = vadd.f32 %v381_v19, %v380_v18  ;;  %v419_v21 = vrot.slane %v418_v20, 2 }
 0x103   :  { %v383_v23 = vrot.slane %v382_v22, 1  ;;  %v420_v24 = vadd.f32 %v419_v21, %v418_v20 }
 0x105   :  { %v384_v25 = vadd.f32 %v383_v23, %v382_v22  ;;  %v421_v26 = vrot.slane %v420_v24, 1 }
 0x107   :  { %385 = vst [vmem:[%s654_s3] sm:$0x1] %v384_v25  ;;  %v422_v27 = vadd.f32 %v421_v26, %v420_v24 }
 0x109   :  { %423 = vst [vmem:[%s654_s3 + $0x1] sm:$0x1] %v422_v27 }

// kernel: residual_block_forward.9
= control target key start
LH: loop header
LB: loop body
LE: loop exit
PB: predicated region body
PF: predicated region fallthrough
CT: control target
= control target key end

     0   :  { %s560_s0 = inlined_call_operand.vmem [shape: bf16[128,128], index: 0, kind: input, shape index: {}]   ;;  %s561_s1 = inlined_call_operand.vmem [shape: f32[1,128], index: 1, kind: input, shape index: {}]   ;;  %s562_s2 = inlined_call_operand.vmem [shape: f32[1,128], index: 2, kind: input, shape index: {}]   ;;  %s563_s3 = inlined_call_operand.vmem [shape: bf16[128,128], index: 3, kind: input, shape index: {}]   ;;  %s564_s4 = inlined_call_operand.vmem [shape: f32[1,128], index: 4, kind: input, shape index: {}]   ;;  %s565_s5 = inlined_call_operand.vmem [shape: f32[1,128], index: 5, kind: input, shape index: {}]   ;;  %s566_s6 = inlined_call_operand.vmem [shape: f32[128,128], index: 6, kind: output, shape index: {}]  }
   0x1   :  { %v268_v0 = vld [vmem:[%s560_s0] sm:$0xff]   ;;  %v331_v9 = vld [vmem:[%s560_s0 + $0x8] sm:$0xff]   ;;  %v332_v20 = vld [vmem:[%s560_s0 + $0x10] sm:$0xff]  }
   0x2   :  { %v386_v1 = vld [vmem:[%s561_s1] ss:$0 sm:$0xff]  ;;  %v269_v2 = vunpack.c.l.bf16 %v268_v0  ;;  %v270_v5 = vunpack.c.h.bf16 %v268_v0  ;;  %v338_v10 = vld [vmem:[%s563_s3 + $0x8] sm:$0xff]   ;;  %v273_v14 = vunpack.c.l.bf16 %v331_v9  ;;  %v274_v18 = vunpack.c.h.bf16 %v331_v9  ;;  %v339_v21 = vld [vmem:[%s563_s3 + $0x10] sm:$0xff]  }
   0x3   :  { %v300_v3 = vld [vmem:[%s563_s3] sm:$0xff]   ;;  %v305_v15 = vunpack.c.l.bf16 %v338_v10  ;;  %v306_v19 = vunpack.c.h.bf16 %v338_v10  ;;  %v277_v32 = vunpack.c.l.bf16 %v332_v20  ;;  %v309_v33 = vunpack.c.l.bf16 %v339_v21  ;;  %v333_v47 = vld [vmem:[%s560_s0 + $0x18] sm:$0xff]  }
   0x4   :  { %v394_v4 = vld [vmem:[%s564_s4] ss:$0 sm:$0xff]  ;;  %v301_v7 = vunpack.c.l.bf16 %v300_v3  ;;  %v302_v8 = vunpack.c.h.bf16 %v300_v3  ;;  %v62_v11 = vmul.f32 %v269_v2, %v386_v1  ;;  %v63_v13 = vmul.f32 %v270_v5, %v386_v1  ;;  %v340_v48 = vld [vmem:[%s563_s3 + $0x18] sm:$0xff]  }
   0x5   :  { %v399_v6 = vld [vmem:[%s562_s2] ss:$0 sm:$0xff]  ;;  %v64_v24 = vmul.f32 %v273_v14, %v386_v1  ;;  %v142_v25 = vmul.f32 %v305_v15, %v394_v4  ;;  %v65_v28 = vmul.f32 %v274_v18, %v386_v1  ;;  %v143_v29 = vmul.f32 %v306_v19, %v394_v4 }
   0x6   :  { %v411_v12 = vld [vmem:[%s565_s5] ss:$0 sm:$0xff]  ;;  %v140_v16 = vmul.f32 %v301_v7, %v394_v4  ;;  %v141_v17 = vmul.f32 %v302_v8, %v394_v4  ;;  %v85_v22 = vadd.f32 %v399_v6, %v62_v11  ;;  %v86_v23 = vadd.f32 %v399_v6, %v63_v13 }
   0x7   :  { %v87_v30 = vadd.f32 %v399_v6, %v64_v24  ;;  %v165_v31 = vadd.f32 %v411_v12, %v142_v25  ;;  %v88_v36 = vadd.f32 %v399_v6, %v65_v28  ;;  %v166_v37 = vadd.f32 %v411_v12, %v143_v29  ;;  %v334_v60 = vld [vmem:[%s560_s0 + $0x20] sm:$0xff]   ;;  %v335_v28 = vld [vmem:[%s560_s0 + $0x28] sm:$0xff]  }
   0x8   :  { %v163_v26 = vadd.f32 %v411_v12, %v140_v16  ;;  %v164_v27 = vadd.f32 %v411_v12, %v141_v17  ;;  %v66_v39 = vmul.f32 %v277_v32, %v386_v1  ;;  %v144_v40 = vmul.f32 %v309_v33, %v394_v4  ;;  %v341_v2 = vld [vmem:[%s563_s3 + $0x20] sm:$0xff]   ;;  %v342_v32 = vld [vmem:[%s563_s3 + $0x28] sm:$0xff]  }
   0x9   :  { %v181_v38 = vadd.f32 %v165_v31, %v87_v30  ;;  %v278_v41 = vunpack.c.h.bf16 %v332_v20  ;;  %v182_v45 = vadd.f32 %v166_v37, %v88_v36  ;;  %v310_v55 = vunpack.c.h.bf16 %v339_v21 }
   0xa   :  { %v179_v34 = vadd.f32 %v163_v26, %v85_v22  ;;  %v180_v35 = vadd.f32 %v164_v27, %v86_v23  ;;  %v89_v46 = vadd.f32 %v399_v6, %v66_v39  ;;  %v167_v51 = vadd.f32 %v411_v12, %v144_v40  ;;  %v336_v40 = vld [vmem:[%s560_s0 + $0x30] sm:$0xff]  }
   0xb   :  { %vm197_vm2 = vcmp.ge.f32.partialorder %v181_v38, 0.0  ;;  %v213_v44 = vmul.f32 0.2, %v181_v38  ;;  %v67_v52 = vmul.f32 %v278_v41, %v386_v1  ;;  %vm198_vm3 = vcmp.ge.f32.partialorder %v182_v45, 0.0 }
   0xc   :  { %vm195_vm0 = vcmp.ge.f32.partialorder %v179_v34, 0.0  ;;  %v211_v42 = vmul.f32 0.2, %v179_v34  ;;  %vm196_vm1 = vcmp.ge.f32.partialorder %v180_v35, 0.0  ;;  %v212_v43 = vmul.f32 0.2, %v180_v35 }
   0xd   :  { %v229_v53 = vsel %vm197_vm2, %v181_v38, %v213_v44  ;;  %v214_v54 = vmul.f32 0.2, %v182_v45  ;;  %v183_v56 = vadd.f32 %v167_v51, %v89_v46  ;;  %v90_v57 = vadd.f32 %v399_v6, %v67_v52 }
   0xe   :  { %v227_v49 = vsel %vm195_vm0, %v179_v34, %v211_v42  ;;  %v228_v50 = vsel %vm196_vm1, %v180_v35, %v212_v43  ;;  %245 = vst [vmem:[%s566_s6 + $0x10] sm:$0xff] %v229_v53  ;;  %v281_v58 = vunpack.c.l.bf16 %v333_v47  ;;  %v313_v59 = vunpack.c.l.bf16 %v340_v48 }
   0xf   :  { %243 = vst [vmem:[%s566_s6] sm:$0xff] %v227_v49  ;;  %244 = vst [vmem:[%s566_s6 + $0x8] sm:$0xff] %v228_v50  ;;  %v230_v61 = vsel %vm198_vm3, %v182_v45, %v214_v54  ;;  %v145_v62 = vmul.f32 %v310_v55, %v394_v4  ;;  %v282_v63 = vunpack.c.h.bf16 %v333_v47  ;;  %v314_v0 = vunpack.c.h.bf16 %v340_v48  ;;  %v343_v45 = vld [vmem:[%s563_s3 + $0x30] sm:$0xff]  }
  0x10   :  { %246 = vst [vmem:[%s566_s6 + $0x18] sm:$0xff] %v230_v61  ;;  %vm199_vm4 = vcmp.ge.f32.partialorder %v183_v56, 0.0  ;;  %v215_v3 = vmul.f32 0.2, %v183_v56  ;;  %v68_v5 = vmul.f32 %v281_v58, %v386_v1  ;;  %v146_v7 = vmul.f32 %v313_v59, %v394_v4 }
  0x11   :  { %v168_v8 = vadd.f32 %v411_v12, %v145_v62  ;;  %v69_v9 = vmul.f32 %v282_v63, %v386_v1  ;;  %v147_v10 = vmul.f32 %v314_v0, %v394_v4  ;;  %v285_v11 = vunpack.c.l.bf16 %v334_v60 }
  0x12   :  { %v231_v13 = vsel %vm199_vm4, %v183_v56, %v215_v3  ;;  %v91_v14 = vadd.f32 %v399_v6, %v68_v5  ;;  %v169_v15 = vadd.f32 %v411_v12, %v146_v7  ;;  %v317_v16 = vunpack.c.l.bf16 %v341_v2 }
  0x13   :  { %247 = vst [vmem:[%s566_s6 + $0x20] sm:$0xff] %v231_v13  ;;  %v184_v17 = vadd.f32 %v168_v8, %v90_v57  ;;  %v92_v18 = vadd.f32 %v399_v6, %v69_v9  ;;  %v170_v19 = vadd.f32 %v411_v12, %v147_v10  ;;  %v70_v20 = vmul.f32 %v285_v11, %v386_v1  ;;  %v337_v57 = vld [vmem:[%s560_s0 + $0x38] sm:$0xff]  }
  0x14   :  { %v185_v21 = vadd.f32 %v169_v15, %v91_v14  ;;  %v148_v22 = vmul.f32 %v317_v16, %v394_v4  ;;  %v286_v23 = vunpack.c.h.bf16 %v334_v60  ;;  %v318_v24 = vunpack.c.h.bf16 %v341_v2  ;;  %v344_v13 = vld [vmem:[%s563_s3 + $0x38] sm:$0xff]  }
  0x15   :  { %vm200_vm5 = vcmp.ge.f32.partialorder %v184_v17, 0.0  ;;  %v216_v25 = vmul.f32 0.2, %v184_v17  ;;  %v186_v26 = vadd.f32 %v170_v19, %v92_v18  ;;  %v93_v27 = vadd.f32 %v399_v6, %v70_v20 }
  0x16   :  { %vm201_vm6 = vcmp.ge.f32.partialorder %v185_v21, 0.0  ;;  %v217_v29 = vmul.f32 0.2, %v185_v21  ;;  %v171_v30 = vadd.f32 %v411_v12, %v148_v22  ;;  %v71_v31 = vmul.f32 %v286_v23, %v386_v1 }
  0x17   :  { %v232_v33 = vsel %vm200_vm5, %v184_v17, %v216_v25  ;;  %vm202_vm7 = vcmp.ge.f32.partialorder %v186_v26, 0.0  ;;  %v218_v34 = vmul.f32 0.2, %v186_v26  ;;  %v149_v35 = vmul.f32 %v318_v24, %v394_v4 }
  0x18   :  { %248 = vst [vmem:[%s566_s6 + $0x28] sm:$0xff] %v232_v33  ;;  %v233_v36 = vsel %vm201_vm6, %v185_v21, %v217_v29  ;;  %v187_v37 = vadd.f32 %v171_v30, %v93_v27  ;;  %v94_v38 = vadd.f32 %v399_v6, %v71_v31  ;;  %v289_v39 = vunpack.c.l.bf16 %v335_v28 }
  0x19   :  { %249 = vst [vmem:[%s566_s6 + $0x30] sm:$0xff] %v233_v36  ;;  %v234_v41 = vsel %vm202_vm7, %v186_v26, %v218_v34  ;;  %v172_v42 = vadd.f32 %v411_v12, %v149_v35  ;;  %v321_v43 = vunpack.c.l.bf16 %v342_v32  ;;  %v290_v44 = vunpack.c.h.bf16 %v335_v28 }
  0x1a   :  { %250 = vst [vmem:[%s566_s6 + $0x38] sm:$0xff] %v234_v41  ;;  %vm203_vm8 = vcmp.ge.f32.partialorder %v187_v37, 0.0  ;;  %v219_v46 = vmul.f32 0.2, %v187_v37  ;;  %v72_v47 = vmul.f32 %v289_v39, %v386_v1  ;;  %v322_v48 = vunpack.c.h.bf16 %v342_v32 }
  0x1b   :  { %v188_v49 = vadd.f32 %v172_v42, %v94_v38  ;;  %v150_v50 = vmul.f32 %v321_v43, %v394_v4  ;;  %v73_v51 = vmul.f32 %v290_v44, %v386_v1  ;;  %v293_v52 = vunpack.c.l.bf16 %v336_v40 }
  0x1c   :  { %v235_v53 = vsel %vm203_vm8, %v187_v37, %v219_v46  ;;  %v95_v54 = vadd.f32 %v399_v6, %v72_v47  ;;  %v151_v55 = vmul.f32 %v322_v48, %v394_v4  ;;  %v325_v56 = vunpack.c.l.bf16 %v343_v45 }
  0x1d   :  { %251 = vst [vmem:[%s566_s6 + $0x40] sm:$0xff] %v235_v53  ;;  %vm204_vm9 = vcmp.ge.f32.partialorder %v188_v49, 0.0  ;;  %v220_v58 = vmul.f32 0.2, %v188_v49  ;;  %v173_v59 = vadd.f32 %v411_v12, %v150_v50  ;;  %v96_v60 = vadd.f32 %v399_v6, %v73_v51 }
  0x1e   :  { %v174_v61 = vadd.f32 %v411_v12, %v151_v55  ;;  %v74_v62 = vmul.f32 %v293_v52, %v386_v1  ;;  %v152_v63 = vmul.f32 %v325_v56, %v394_v4  ;;  %v294_v0 = vunpack.c.h.bf16 %v336_v40 }
  0x1f   :  { %v236_v2 = vsel %vm204_vm9, %v188_v49, %v220_v58  ;;  %v189_v3 = vadd.f32 %v173_v59, %v95_v54  ;;  %v326_v5 = vunpack.c.h.bf16 %v343_v45  ;;  %v297_v7 = vunpack.c.l.bf16 %v337_v57 }
  0x20   :  { %252 = vst [vmem:[%s566_s6 + $0x48] sm:$0xff] %v236_v2  ;;  %v190_v8 = vadd.f32 %v174_v61, %v96_v60  ;;  %v97_v9 = vadd.f32 %v399_v6, %v74_v62  ;;  %v175_v10 = vadd.f32 %v411_v12, %v152_v63  ;;  %v75_v11 = vmul.f32 %v294_v0, %v386_v1 }
  0x21   :  { %vm205_vm10 = vcmp.ge.f32.partialorder %v189_v3, 0.0  ;;  %v221_v14 = vmul.f32 0.2, %v189_v3  ;;  %v153_v15 = vmul.f32 %v326_v5, %v394_v4  ;;  %v76_v16 = vmul.f32 %v297_v7, %v386_v1 }
  0x22   :  { %vm206_vm11 = vcmp.ge.f32.partialorder %v190_v8, 0.0  ;;  %v222_v17 = vmul.f32 0.2, %v190_v8  ;;  %v191_v18 = vadd.f32 %v175_v10, %v97_v9  ;;  %v98_v19 = vadd.f32 %v399_v6, %v75_v11 }
  0x23   :  { %v237_v20 = vsel %vm205_vm10, %v189_v3, %v221_v14  ;;  %v176_v21 = vadd.f32 %v411_v12, %v153_v15  ;;  %v329_v22 = vunpack.c.l.bf16 %v344_v13  ;;  %v298_v25 = vunpack.c.h.bf16 %v337_v57 }
  0x24   :  { %253 = vst [vmem:[%s566_s6 + $0x50] sm:$0xff] %v237_v20  ;;  %v238_v23 = vsel %vm206_vm11, %v190_v8, %v222_v17  ;;  %vm207_vm12 = vcmp.ge.f32.partialorder %v191_v18, 0.0  ;;  %v223_v24 = vmul.f32 0.2, %v191_v18  ;;  %v99_v27 = vadd.f32 %v399_v6, %v76_v16 }
  0x25   :  { %254 = vst [vmem:[%s566_s6 + $0x58] sm:$0xff] %v238_v23  ;;  %v192_v26 = vadd.f32 %v176_v21, %v98_v19  ;;  %v154_v28 = vmul.f32 %v329_v22, %v394_v4  ;;  %v330_v29 = vunpack.c.h.bf16 %v344_v13  ;;  %v77_v31 = vmul.f32 %v298_v25, %v386_v1 }
  0x26   :  { %v239_v30 = vsel %vm207_vm12, %v191_v18, %v223_v24 }
  0x27   :  { %255 = vst [vmem:[%s566_s6 + $0x60] sm:$0xff] %v239_v30  ;;  %vm208_vm13 = vcmp.ge.f32.partialorder %v192_v26, 0.0  ;;  %v224_v32 = vmul.f32 0.2, %v192_v26  ;;  %v177_v33 = vadd.f32 %v411_v12, %v154_v28  ;;  %v155_v34 = vmul.f32 %v330_v29, %v394_v4 }
  0x28   :  { %v100_v35 = vadd.f32 %v399_v6, %v77_v31 }
  0x29   :  { %v240_v36 = vsel %vm208_vm13, %v192_v26, %v224_v32  ;;  %v193_v37 = vadd.f32 %v177_v33, %v99_v27  ;;  %v178_v38 = vadd.f32 %v411_v12, %v155_v34 }
  0x2a   :  { %256 = vst [vmem:[%s566_s6 + $0x68] sm:$0xff] %v240_v36 }
  0x2b   :  { %vm209_vm14 = vcmp.ge.f32.partialorder %v193_v37, 0.0  ;;  %v225_v1 = vmul.f32 0.2, %v193_v37  ;;  %v194_v39 = vadd.f32 %v178_v38, %v100_v35 }
  0x2d   :  { %v241_v40 = vsel %vm209_vm14, %v193_v37, %v225_v1  ;;  %vm210_vm15 = vcmp.ge.f32.partialorder %v194_v39, 0.0  ;;  %v226_v41 = vmul.f32 0.2, %v194_v39 }
  0x2e   :  { %257 = vst [vmem:[%s566_s6 + $0x70] sm:$0xff] %v241_v40 }
  0x2f   :  { %v242_v4 = vsel %vm210_vm15, %v194_v39, %v226_v41 }
  0x30   :  { %258 = vst [vmem:[%s566_s6 + $0x78] sm:$0xff] %v242_v4 }

</bundles_post_ra>
